<compile_context>
chip_gen: v6e
topology: v6e:2x2x1
jax: 0.10.0
libtpu: 0.0.40
codegen_flags: <defaults>
</compile_context>

<pallas_src>
import jax
import jax.numpy as jnp
from jax import lax
from jax.experimental import pallas as pl
from jax.experimental.pallas import tpu as pltpu


def _dw3x3_kernel(x_ref, w_ref, o_ref, xp_ref, acc_ref):
    """Reflect-pad(1) + 3x3 depthwise conv for one (batch, channel-tile) block.

    x_ref:   (1, TC, H, W)    unpadded NCHW input block
    w_ref:   (9, TC, 1, 1)    f32 taps, index k = 3*dy + dx
    o_ref:   (1, TC, H, W)    output block
    xp_ref:  (TC, H+2, W+2)   f32 scratch: reflect-padded plane, built in VMEM
    acc_ref: (TC, H, W)       f32 scratch accumulator
    """
    _, hp2, wp2 = xp_ref.shape
    H, W = hp2 - 2, wp2 - 2

    x = x_ref[0].astype(jnp.float32)                          # (TC, H, W)

    # ---- fused ReflectionPad2d(1), entirely in VMEM (no extra HBM pass) ----
    xp_ref[:, 1:H + 1, 1:W + 1] = x                           # interior
    xp_ref[:, 0:1, 1:W + 1] = x[:, 1:2, :]                    # top row    = row 1
    xp_ref[:, H + 1:H + 2, 1:W + 1] = x[:, H - 2:H - 1, :]    # bottom row = row H-2
    xp_ref[:, :, 0:1] = xp_ref[:, :, 2:3]                     # left col   = col 1 (fixes corners too)
    xp_ref[:, :, W + 1:W + 2] = xp_ref[:, :, W - 1:W]         # right col  = col W-2

    # ---- dx (lane-dim) shifts hoisted: 3 column-shifted views, reused across dy ----
    cols = [xp_ref[:, :, dx:dx + W] for dx in range(3)]       # each (TC, H+2, W)

    # ---- 9-tap f32 accumulation into VMEM scratch ----
    acc_ref[...] = cols[0][:, 0:H, :] * w_ref[0]
    for k in range(1, 9):
        dy, dx = divmod(k, 3)
        acc_ref[...] += cols[dx][:, dy:dy + H, :] * w_ref[k]

    o_ref[0] = acc_ref[...].astype(o_ref.dtype)


def _per_channel_vmem_bytes(H, W, in_itemsize, out_itemsize):
    """Rough per-channel VMEM footprint of one grid step."""
    tile_f32 = (H + 2) * (W + 2) * 4
    return (H * W * (2 * in_itemsize + 2 * out_itemsize)   # double-buffered in/out blocks
            + 6 * tile_f32                                  # padded + acc scratch + traced temps
            + 2 * 9 * 8 * 128 * 4)                          # (8,128)-padded tap block, double-buffered


def _pick_channel_tile(C, H, W, in_itemsize, out_itemsize, budget_bytes):
    """Largest divisor of C whose per-step VMEM footprint fits the budget."""
    per_ch = _per_channel_vmem_bytes(H, W, in_itemsize, out_itemsize)
    max_tc = max(1, int(budget_bytes // per_ch))
    if max_tc >= C:
        return C
    best = 1
    for d in range(1, max_tc + 1):
        if C % d == 0:
            best = d
    return best


def depthwise_conv(x, weight, bias=None, *, vmem_budget_bytes=24 * 1024 * 1024):
    """Depthwise 3x3 conv with reflection padding 1, stride 1 (NCHW, PyTorch layout).

    x:      (N, C, H, W)
    weight: (C, 1, 3, 3)
    bias:   (C,) or None
    returns (N, C, H, W) in x.dtype
    """
    N, C, H, W = x.shape
    assert weight.shape == (C, 1, 3, 3)
    assert H >= 2 and W >= 2, "ReflectionPad2d(1) requires H, W >= 2"

    # (C, 1, 3, 3) -> (9, C, 1, 1) f32 taps, k = 3*ky + kx.
    w9 = jnp.transpose(weight[:, 0, :, :].reshape(C, 9), (1, 0)).reshape(9, C, 1, 1)
    w9 = w9.astype(jnp.float32)

    in_sz = jnp.dtype(x.dtype).itemsize
    out_sz = jnp.dtype(x.dtype).itemsize
    tc = _pick_channel_tile(C, H, W, in_sz, out_sz, vmem_budget_bytes)

    footprint = _per_channel_vmem_bytes(H, W, in_sz, out_sz) * tc
    vmem_limit = int(min(64 * 1024 * 1024, max(footprint + (8 << 20), 32 << 20)))

    out = pl.pallas_call(
        _dw3x3_kernel,
        out_shape=jax.ShapeDtypeStruct((N, C, H, W), x.dtype),
        grid_spec=pltpu.PrefetchScalarGridSpec(
            num_scalar_prefetch=0,
            grid=(N, C // tc),
            in_specs=[
                pl.BlockSpec((1, tc, H, W), lambda n, c: (n, c, 0, 0)),
                pl.BlockSpec((9, tc, 1, 1), lambda n, c: (0, c, 0, 0)),
            ],
            out_specs=pl.BlockSpec((1, tc, H, W), lambda n, c: (n, c, 0, 0)),
            scratch_shapes=[
                pltpu.VMEM((tc, H + 2, W + 2), jnp.float32),   # fused reflect-padded plane
                pltpu.VMEM((tc, H, W), jnp.float32),           # f32 accumulator
            ],
        ),
        compiler_params=pltpu.CompilerParams(
            dimension_semantics=("parallel", "parallel"),
            vmem_limit_bytes=vmem_limit,
        ),
    )(x, w9)

    if bias is not None:
        # TODO(synk): fuse bias into the in-kernel f32 accumulation (saves an HBM pass
        #             and matches PyTorch's accumulate-then-cast exactly for bf16).
        out = out + bias.reshape(1, C, 1, 1).astype(out.dtype)
    return out


def depthwise_conv_ref(x, weight):
    """Pure-JAX reference mirroring the PyTorch forward (reflect pad + depthwise conv)."""
    xp = jnp.pad(x, ((0, 0), (0, 0), (1, 1), (1, 1)), mode="reflect")
    return lax.conv_general_dilated(
        xp, weight,
        window_strides=(1, 1),
        padding="VALID",
        dimension_numbers=("NCHW", "OIHW", "NCHW"),
        feature_group_count=x.shape[1],
    )


if __name__ == "__main__":
    key = jax.random.PRNGKey(0)
    N, C, H, W = 2, 4, 16, 16

    kx, kw = jax.random.split(key)
    x = jax.random.normal(kx, (N, C, H, W), dtype=jnp.float32)
    # Deterministic analogue of nn.init.trunc_normal_(std=0.02); bias=False (module default).
    weight = 0.02 * jax.random.truncated_normal(kw, -2.0, 2.0, (C, 1, 3, 3), dtype=jnp.float32)

    out = depthwise_conv(x, weight)
    out = jax.block_until_ready(out)

    ref = depthwise_conv_ref(x, weight)
    assert out.shape == (N, C, H, W)
    assert jnp.allclose(out, ref, atol=1e-5, rtol=1e-5), "mismatch vs reference"

    print("KERNEL_OK")
</pallas_src>

<mosaic_0001>
module attributes {stable_mosaic.version = 11 : i64} {
  func.func @_dw3x3_kernel(%arg0: i32, %arg1: i32, %arg2: memref<1x4x16x16xf32, #tpu.memory_space<vmem>>, %arg3: memref<9x4x1x1xf32, #tpu.memory_space<vmem>>, %arg4: memref<1x4x16x16xf32, #tpu.memory_space<vmem>>, %arg5: memref<4x18x18xf32, #tpu.memory_space<vmem>>, %arg6: memref<4x16x16xf32, #tpu.memory_space<vmem>>) attributes {dimension_semantics = [#tpu.dimension_semantics<parallel>, #tpu.dimension_semantics<parallel>], iteration_bounds = array<i64: 2, 1>, scalar_prefetch = 0 : i64, scratch_operands = 2 : i64, tpu.core_type = #tpu.core_type<tc>, window_params = [{transform_indices = @transform_0, window_bounds = array<i64: 1, 4, 16, 16>}, {transform_indices = @transform_1, window_bounds = array<i64: 9, 4, 1, 1>}, {transform_indices = @transform_2, window_bounds = array<i64: 1, 4, 16, 16>}]} {
    %c0 = arith.constant 0 : index
    %c0_0 = arith.constant 0 : index
    %c0_1 = arith.constant 0 : index
    %c0_2 = arith.constant 0 : index
    %0 = vector.load %arg2[%c0, %c0_0, %c0_1, %c0_2] : memref<1x4x16x16xf32, #tpu.memory_space<vmem>>, vector<1x4x16x16xf32>
    %1 = vector.shape_cast %0 : vector<1x4x16x16xf32> to vector<4x16x16xf32>
    %c0_3 = arith.constant 0 : index
    %c1 = arith.constant 1 : index
    %c1_4 = arith.constant 1 : index
    %2 = vector.load %arg5[%c0_3, %c1, %c1_4] : memref<4x18x18xf32, #tpu.memory_space<vmem>>, vector<4x16x16xf32>
    tpu.vector_store %arg5[%c0_3, %c1, %c1_4], %1 {strides = array<i32>} : memref<4x18x18xf32, #tpu.memory_space<vmem>>, vector<4x16x16xf32>,
    %3 = vector.extract_strided_slice %1 {offsets = [0, 1, 0], sizes = [4, 1, 16], strides = [1, 1, 1]} : vector<4x16x16xf32> to vector<4x1x16xf32>
    %c0_5 = arith.constant 0 : index
    %c0_6 = arith.constant 0 : index
    %c1_7 = arith.constant 1 : index
    %4 = vector.load %arg5[%c0_5, %c0_6, %c1_7] : memref<4x18x18xf32, #tpu.memory_space<vmem>>, vector<4x1x16xf32>
    tpu.vector_store %arg5[%c0_5, %c0_6, %c1_7], %3 {strides = array<i32>} : memref<4x18x18xf32, #tpu.memory_space<vmem>>, vector<4x1x16xf32>,
    %5 = vector.extract_strided_slice %1 {offsets = [0, 14, 0], sizes = [4, 1, 16], strides = [1, 1, 1]} : vector<4x16x16xf32> to vector<4x1x16xf32>
    %c0_8 = arith.constant 0 : index
    %c17 = arith.constant 17 : index
    %c1_9 = arith.constant 1 : index
    %6 = vector.load %arg5[%c0_8, %c17, %c1_9] : memref<4x18x18xf32, #tpu.memory_space<vmem>>, vector<4x1x16xf32>
    tpu.vector_store %arg5[%c0_8, %c17, %c1_9], %5 {strides = array<i32>} : memref<4x18x18xf32, #tpu.memory_space<vmem>>, vector<4x1x16xf32>,
    %c0_10 = arith.constant 0 : index
    %c0_11 = arith.constant 0 : index
    %c2 = arith.constant 2 : index
    %7 = vector.load %arg5[%c0_10, %c0_11, %c2] : memref<4x18x18xf32, #tpu.memory_space<vmem>>, vector<4x18x1xf32>
    %c0_12 = arith.constant 0 : index
    %c0_13 = arith.constant 0 : index
    %c0_14 = arith.constant 0 : index
    %8 = vector.load %arg5[%c0_12, %c0_13, %c0_14] : memref<4x18x18xf32, #tpu.memory_space<vmem>>, vector<4x18x1xf32>
    tpu.vector_store %arg5[%c0_12, %c0_13, %c0_14], %7 {strides = array<i32>} : memref<4x18x18xf32, #tpu.memory_space<vmem>>, vector<4x18x1xf32>,
    %c0_15 = arith.constant 0 : index
    %c0_16 = arith.constant 0 : index
    %c15 = arith.constant 15 : index
    %9 = vector.load %arg5[%c0_15, %c0_16, %c15] : memref<4x18x18xf32, #tpu.memory_space<vmem>>, vector<4x18x1xf32>
    %c0_17 = arith.constant 0 : index
    %c0_18 = arith.constant 0 : index
    %c17_19 = arith.constant 17 : index
    %10 = vector.load %arg5[%c0_17, %c0_18, %c17_19] : memref<4x18x18xf32, #tpu.memory_space<vmem>>, vector<4x18x1xf32>
    tpu.vector_store %arg5[%c0_17, %c0_18, %c17_19], %9 {strides = array<i32>} : memref<4x18x18xf32, #tpu.memory_space<vmem>>, vector<4x18x1xf32>,
    %c0_20 = arith.constant 0 : index
    %c0_21 = arith.constant 0 : index
    %c0_22 = arith.constant 0 : index
    %11 = vector.load %arg5[%c0_20, %c0_21, %c0_22] : memref<4x18x18xf32, #tpu.memory_space<vmem>>, vector<4x18x16xf32>
    %c0_23 = arith.constant 0 : index
    %c0_24 = arith.constant 0 : index
    %c1_25 = arith.constant 1 : index
    %12 = vector.load %arg5[%c0_23, %c0_24, %c1_25] : memref<4x18x18xf32, #tpu.memory_space<vmem>>, vector<4x18x16xf32>
    %c0_26 = arith.constant 0 : index
    %c0_27 = arith.constant 0 : index
    %c2_28 = arith.constant 2 : index
    %13 = vector.load %arg5[%c0_26, %c0_27, %c2_28] : memref<4x18x18xf32, #tpu.memory_space<vmem>>, vector<4x18x16xf32>
    %14 = vector.extract_strided_slice %11 {offsets = [0, 0, 0], sizes = [4, 16, 16], strides = [1, 1, 1]} : vector<4x18x16xf32> to vector<4x16x16xf32>
    %c0_29 = arith.constant 0 : index
    %c0_30 = arith.constant 0 : index
    %c0_31 = arith.constant 0 : index
    %c0_32 = arith.constant 0 : index
    %15 = vector.load %arg3[%c0_29, %c0_30, %c0_31, %c0_32] : memref<9x4x1x1xf32, #tpu.memory_space<vmem>>, vector<1x4x1x1xf32>
    %16 = vector.shape_cast %15 : vector<1x4x1x1xf32> to vector<4x1x1xf32>
    %17 = vector.broadcast %16 : vector<4x1x1xf32> to vector<4x16x16xf32>
    %18 = arith.mulf %14, %17 : vector<4x16x16xf32>
    %c0_33 = arith.constant 0 : index
    %c0_34 = arith.constant 0 : index
    %c0_35 = arith.constant 0 : index
    %19 = vector.load %arg6[%c0_33, %c0_34, %c0_35] : memref<4x16x16xf32, #tpu.memory_space<vmem>>, vector<4x16x16xf32>
    tpu.vector_store %arg6[%c0_33, %c0_34, %c0_35], %18 {strides = array<i32>} : memref<4x16x16xf32, #tpu.memory_space<vmem>>, vector<4x16x16xf32>,
    %c0_36 = arith.constant 0 : index
    %c0_37 = arith.constant 0 : index
    %c0_38 = arith.constant 0 : index
    %20 = vector.load %arg6[%c0_36, %c0_37, %c0_38] : memref<4x16x16xf32, #tpu.memory_space<vmem>>, vector<4x16x16xf32>
    %21 = vector.extract_strided_slice %12 {offsets = [0, 0, 0], sizes = [4, 16, 16], strides = [1, 1, 1]} : vector<4x18x16xf32> to vector<4x16x16xf32>
    %c1_39 = arith.constant 1 : index
    %c0_40 = arith.constant 0 : index
    %c0_41 = arith.constant 0 : index
    %c0_42 = arith.constant 0 : index
    %22 = vector.load %arg3[%c1_39, %c0_40, %c0_41, %c0_42] : memref<9x4x1x1xf32, #tpu.memory_space<vmem>>, vector<1x4x1x1xf32>
    %23 = vector.shape_cast %22 : vector<1x4x1x1xf32> to vector<4x1x1xf32>
    %24 = vector.broadcast %23 : vector<4x1x1xf32> to vector<4x16x16xf32>
    %25 = arith.mulf %21, %24 : vector<4x16x16xf32>
    %26 = arith.addf %20, %25 : vector<4x16x16xf32>
    %c0_43 = arith.constant 0 : index
    %c0_44 = arith.constant 0 : index
    %c0_45 = arith.constant 0 : index
    %27 = vector.load %arg6[%c0_43, %c0_44, %c0_45] : memref<4x16x16xf32, #tpu.memory_space<vmem>>, vector<4x16x16xf32>
    tpu.vector_store %arg6[%c0_43, %c0_44, %c0_45], %26 {strides = array<i32>} : memref<4x16x16xf32, #tpu.memory_space<vmem>>, vector<4x16x16xf32>,
    %c0_46 = arith.constant 0 : index
    %c0_47 = arith.constant 0 : index
    %c0_48 = arith.constant 0 : index
    %28 = vector.load %arg6[%c0_46, %c0_47, %c0_48] : memref<4x16x16xf32, #tpu.memory_space<vmem>>, vector<4x16x16xf32>
    %29 = vector.extract_strided_slice %13 {offsets = [0, 0, 0], sizes = [4, 16, 16], strides = [1, 1, 1]} : vector<4x18x16xf32> to vector<4x16x16xf32>
    %c2_49 = arith.constant 2 : index
    %c0_50 = arith.constant 0 : index
    %c0_51 = arith.constant 0 : index
    %c0_52 = arith.constant 0 : index
    %30 = vector.load %arg3[%c2_49, %c0_50, %c0_51, %c0_52] : memref<9x4x1x1xf32, #tpu.memory_space<vmem>>, vector<1x4x1x1xf32>
    %31 = vector.shape_cast %30 : vector<1x4x1x1xf32> to vector<4x1x1xf32>
    %32 = vector.broadcast %31 : vector<4x1x1xf32> to vector<4x16x16xf32>
    %33 = arith.mulf %29, %32 : vector<4x16x16xf32>
    %34 = arith.addf %28, %33 : vector<4x16x16xf32>
    %c0_53 = arith.constant 0 : index
    %c0_54 = arith.constant 0 : index
    %c0_55 = arith.constant 0 : index
    %35 = vector.load %arg6[%c0_53, %c0_54, %c0_55] : memref<4x16x16xf32, #tpu.memory_space<vmem>>, vector<4x16x16xf32>
    tpu.vector_store %arg6[%c0_53, %c0_54, %c0_55], %34 {strides = array<i32>} : memref<4x16x16xf32, #tpu.memory_space<vmem>>, vector<4x16x16xf32>,
    %c0_56 = arith.constant 0 : index
    %c0_57 = arith.constant 0 : index
    %c0_58 = arith.constant 0 : index
    %36 = vector.load %arg6[%c0_56, %c0_57, %c0_58] : memref<4x16x16xf32, #tpu.memory_space<vmem>>, vector<4x16x16xf32>
    %37 = vector.extract_strided_slice %11 {offsets = [0, 1, 0], sizes = [4, 16, 16], strides = [1, 1, 1]} : vector<4x18x16xf32> to vector<4x16x16xf32>
    %c3 = arith.constant 3 : index
    %c0_59 = arith.constant 0 : index
    %c0_60 = arith.constant 0 : index
    %c0_61 = arith.constant 0 : index
    %38 = vector.load %arg3[%c3, %c0_59, %c0_60, %c0_61] : memref<9x4x1x1xf32, #tpu.memory_space<vmem>>, vector<1x4x1x1xf32>
    %39 = vector.shape_cast %38 : vector<1x4x1x1xf32> to vector<4x1x1xf32>
    %40 = vector.broadcast %39 : vector<4x1x1xf32> to vector<4x16x16xf32>
    %41 = arith.mulf %37, %40 : vector<4x16x16xf32>
    %42 = arith.addf %36, %41 : vector<4x16x16xf32>
    %c0_62 = arith.constant 0 : index
    %c0_63 = arith.constant 0 : index
    %c0_64 = arith.constant 0 : index
    %43 = vector.load %arg6[%c0_62, %c0_63, %c0_64] : memref<4x16x16xf32, #tpu.memory_space<vmem>>, vector<4x16x16xf32>
    tpu.vector_store %arg6[%c0_62, %c0_63, %c0_64], %42 {strides = array<i32>} : memref<4x16x16xf32, #tpu.memory_space<vmem>>, vector<4x16x16xf32>,
    %c0_65 = arith.constant 0 : index
    %c0_66 = arith.constant 0 : index
    %c0_67 = arith.constant 0 : index
    %44 = vector.load %arg6[%c0_65, %c0_66, %c0_67] : memref<4x16x16xf32, #tpu.memory_space<vmem>>, vector<4x16x16xf32>
    %45 = vector.extract_strided_slice %12 {offsets = [0, 1, 0], sizes = [4, 16, 16], strides = [1, 1, 1]} : vector<4x18x16xf32> to vector<4x16x16xf32>
    %c4 = arith.constant 4 : index
    %c0_68 = arith.constant 0 : index
    %c0_69 = arith.constant 0 : index
    %c0_70 = arith.constant 0 : index
    %46 = vector.load %arg3[%c4, %c0_68, %c0_69, %c0_70] : memref<9x4x1x1xf32, #tpu.memory_space<vmem>>, vector<1x4x1x1xf32>
    %47 = vector.shape_cast %46 : vector<1x4x1x1xf32> to vector<4x1x1xf32>
    %48 = vector.broadcast %47 : vector<4x1x1xf32> to vector<4x16x16xf32>
    %49 = arith.mulf %45, %48 : vector<4x16x16xf32>
    %50 = arith.addf %44, %49 : vector<4x16x16xf32>
    %c0_71 = arith.constant 0 : index
    %c0_72 = arith.constant 0 : index
    %c0_73 = arith.constant 0 : index
    %51 = vector.load %arg6[%c0_71, %c0_72, %c0_73] : memref<4x16x16xf32, #tpu.memory_space<vmem>>, vector<4x16x16xf32>
    tpu.vector_store %arg6[%c0_71, %c0_72, %c0_73], %50 {strides = array<i32>} : memref<4x16x16xf32, #tpu.memory_space<vmem>>, vector<4x16x16xf32>,
    %c0_74 = arith.constant 0 : index
    %c0_75 = arith.constant 0 : index
    %c0_76 = arith.constant 0 : index
    %52 = vector.load %arg6[%c0_74, %c0_75, %c0_76] : memref<4x16x16xf32, #tpu.memory_space<vmem>>, vector<4x16x16xf32>
    %53 = vector.extract_strided_slice %13 {offsets = [0, 1, 0], sizes = [4, 16, 16], strides = [1, 1, 1]} : vector<4x18x16xf32> to vector<4x16x16xf32>
    %c5 = arith.constant 5 : index
    %c0_77 = arith.constant 0 : index
    %c0_78 = arith.constant 0 : index
    %c0_79 = arith.constant 0 : index
    %54 = vector.load %arg3[%c5, %c0_77, %c0_78, %c0_79] : memref<9x4x1x1xf32, #tpu.memory_space<vmem>>, vector<1x4x1x1xf32>
    %55 = vector.shape_cast %54 : vector<1x4x1x1xf32> to vector<4x1x1xf32>
    %56 = vector.broadcast %55 : vector<4x1x1xf32> to vector<4x16x16xf32>
    %57 = arith.mulf %53, %56 : vector<4x16x16xf32>
    %58 = arith.addf %52, %57 : vector<4x16x16xf32>
    %c0_80 = arith.constant 0 : index
    %c0_81 = arith.constant 0 : index
    %c0_82 = arith.constant 0 : index
    %59 = vector.load %arg6[%c0_80, %c0_81, %c0_82] : memref<4x16x16xf32, #tpu.memory_space<vmem>>, vector<4x16x16xf32>
    tpu.vector_store %arg6[%c0_80, %c0_81, %c0_82], %58 {strides = array<i32>} : memref<4x16x16xf32, #tpu.memory_space<vmem>>, vector<4x16x16xf32>,
    %c0_83 = arith.constant 0 : index
    %c0_84 = arith.constant 0 : index
    %c0_85 = arith.constant 0 : index
    %60 = vector.load %arg6[%c0_83, %c0_84, %c0_85] : memref<4x16x16xf32, #tpu.memory_space<vmem>>, vector<4x16x16xf32>
    %61 = vector.extract_strided_slice %11 {offsets = [0, 2, 0], sizes = [4, 16, 16], strides = [1, 1, 1]} : vector<4x18x16xf32> to vector<4x16x16xf32>
    %c6 = arith.constant 6 : index
    %c0_86 = arith.constant 0 : index
    %c0_87 = arith.constant 0 : index
    %c0_88 = arith.constant 0 : index
    %62 = vector.load %arg3[%c6, %c0_86, %c0_87, %c0_88] : memref<9x4x1x1xf32, #tpu.memory_space<vmem>>, vector<1x4x1x1xf32>
    %63 = vector.shape_cast %62 : vector<1x4x1x1xf32> to vector<4x1x1xf32>
    %64 = vector.broadcast %63 : vector<4x1x1xf32> to vector<4x16x16xf32>
    %65 = arith.mulf %61, %64 : vector<4x16x16xf32>
    %66 = arith.addf %60, %65 : vector<4x16x16xf32>
    %c0_89 = arith.constant 0 : index
    %c0_90 = arith.constant 0 : index
    %c0_91 = arith.constant 0 : index
    %67 = vector.load %arg6[%c0_89, %c0_90, %c0_91] : memref<4x16x16xf32, #tpu.memory_space<vmem>>, vector<4x16x16xf32>
    tpu.vector_store %arg6[%c0_89, %c0_90, %c0_91], %66 {strides = array<i32>} : memref<4x16x16xf32, #tpu.memory_space<vmem>>, vector<4x16x16xf32>,
    %c0_92 = arith.constant 0 : index
    %c0_93 = arith.constant 0 : index
    %c0_94 = arith.constant 0 : index
    %68 = vector.load %arg6[%c0_92, %c0_93, %c0_94] : memref<4x16x16xf32, #tpu.memory_space<vmem>>, vector<4x16x16xf32>
    %69 = vector.extract_strided_slice %12 {offsets = [0, 2, 0], sizes = [4, 16, 16], strides = [1, 1, 1]} : vector<4x18x16xf32> to vector<4x16x16xf32>
    %c7 = arith.constant 7 : index
    %c0_95 = arith.constant 0 : index
    %c0_96 = arith.constant 0 : index
    %c0_97 = arith.constant 0 : index
    %70 = vector.load %arg3[%c7, %c0_95, %c0_96, %c0_97] : memref<9x4x1x1xf32, #tpu.memory_space<vmem>>, vector<1x4x1x1xf32>
    %71 = vector.shape_cast %70 : vector<1x4x1x1xf32> to vector<4x1x1xf32>
    %72 = vector.broadcast %71 : vector<4x1x1xf32> to vector<4x16x16xf32>
    %73 = arith.mulf %69, %72 : vector<4x16x16xf32>
    %74 = arith.addf %68, %73 : vector<4x16x16xf32>
    %c0_98 = arith.constant 0 : index
    %c0_99 = arith.constant 0 : index
    %c0_100 = arith.constant 0 : index
    %75 = vector.load %arg6[%c0_98, %c0_99, %c0_100] : memref<4x16x16xf32, #tpu.memory_space<vmem>>, vector<4x16x16xf32>
    tpu.vector_store %arg6[%c0_98, %c0_99, %c0_100], %74 {strides = array<i32>} : memref<4x16x16xf32, #tpu.memory_space<vmem>>, vector<4x16x16xf32>,
    %c0_101 = arith.constant 0 : index
    %c0_102 = arith.constant 0 : index
    %c0_103 = arith.constant 0 : index
    %76 = vector.load %arg6[%c0_101, %c0_102, %c0_103] : memref<4x16x16xf32, #tpu.memory_space<vmem>>, vector<4x16x16xf32>
    %77 = vector.extract_strided_slice %13 {offsets = [0, 2, 0], sizes = [4, 16, 16], strides = [1, 1, 1]} : vector<4x18x16xf32> to vector<4x16x16xf32>
    %c8 = arith.constant 8 : index
    %c0_104 = arith.constant 0 : index
    %c0_105 = arith.constant 0 : index
    %c0_106 = arith.constant 0 : index
    %78 = vector.load %arg3[%c8, %c0_104, %c0_105, %c0_106] : memref<9x4x1x1xf32, #tpu.memory_space<vmem>>, vector<1x4x1x1xf32>
    %79 = vector.shape_cast %78 : vector<1x4x1x1xf32> to vector<4x1x1xf32>
    %80 = vector.broadcast %79 : vector<4x1x1xf32> to vector<4x16x16xf32>
    %81 = arith.mulf %77, %80 : vector<4x16x16xf32>
    %82 = arith.addf %76, %81 : vector<4x16x16xf32>
    %c0_107 = arith.constant 0 : index
    %c0_108 = arith.constant 0 : index
    %c0_109 = arith.constant 0 : index
    %83 = vector.load %arg6[%c0_107, %c0_108, %c0_109] : memref<4x16x16xf32, #tpu.memory_space<vmem>>, vector<4x16x16xf32>
    tpu.vector_store %arg6[%c0_107, %c0_108, %c0_109], %82 {strides = array<i32>} : memref<4x16x16xf32, #tpu.memory_space<vmem>>, vector<4x16x16xf32>,
    %c0_110 = arith.constant 0 : index
    %c0_111 = arith.constant 0 : index
    %c0_112 = arith.constant 0 : index
    %84 = vector.load %arg6[%c0_110, %c0_111, %c0_112] : memref<4x16x16xf32, #tpu.memory_space<vmem>>, vector<4x16x16xf32>
    %c0_113 = arith.constant 0 : index
    %c0_114 = arith.constant 0 : index
    %c0_115 = arith.constant 0 : index
    %c0_116 = arith.constant 0 : index
    %85 = vector.load %arg4[%c0_113, %c0_114, %c0_115, %c0_116] : memref<1x4x16x16xf32, #tpu.memory_space<vmem>>, vector<1x4x16x16xf32>
    %86 = vector.shape_cast %85 : vector<1x4x16x16xf32> to vector<4x16x16xf32>
    %87 = vector.shape_cast %84 : vector<4x16x16xf32> to vector<1x4x16x16xf32>
    tpu.vector_store %arg4[%c0_113, %c0_114, %c0_115, %c0_116], %87 {strides = array<i32>} : memref<1x4x16x16xf32, #tpu.memory_space<vmem>>, vector<1x4x16x16xf32>,
    return
  }
  func.func @transform_0(%arg0: i32, %arg1: i32) -> (i32, i32, i32, i32) {
    %c0_i32 = arith.constant 0 : i32
    %c0_i32_0 = arith.constant 0 : i32
    %c0_i32_1 = arith.constant 0 : i32
    return %arg0, %arg1, %c0_i32, %c0_i32_0 : i32, i32, i32, i32
  }
  func.func @transform_1(%arg0: i32, %arg1: i32) -> (i32, i32, i32, i32) {
    %c0_i32 = arith.constant 0 : i32
    %c0_i32_0 = arith.constant 0 : i32
    %c0_i32_1 = arith.constant 0 : i32
    %c0_i32_2 = arith.constant 0 : i32
    return %c0_i32, %arg1, %c0_i32_0, %c0_i32_1 : i32, i32, i32, i32
  }
  func.func @transform_2(%arg0: i32, %arg1: i32) -> (i32, i32, i32, i32) {
    %c0_i32 = arith.constant 0 : i32
    %c0_i32_0 = arith.constant 0 : i32
    %c0_i32_1 = arith.constant 0 : i32
    return %arg0, %arg1, %c0_i32, %c0_i32_0 : i32, i32, i32, i32
  }
}

</mosaic_0001>

<bundles_post_ra>
// kernel: tpu_custom_call.1
= control target key start
LH: loop header
LB: loop body
LE: loop exit
PB: predicated region body
PF: predicated region fallthrough
CT: control target
= control target key end

     0   :  { %7 = vsyncpa [#allocation5], 0  ;;  %s2788_s0 = inlined_call_operand.hbm [shape: f32[2,4,16,16], index: 0, kind: input, shape index: {}]   ;;  %s2789_s1 = inlined_call_operand.vmem [shape: f32[9,4,1,1], index: 1, kind: input, shape index: {}]   ;;  %s2790_s2 = inlined_call_operand.hbm [shape: f32[2,4,16,16], index: 2, kind: output, shape index: {}]  }
   0x1   :  { %9 = vsyncpa [#allocation5 + $0x1], 0 }
   0x2   :  { %10 = vsyncpa [#allocation6], 0 }
   0x3   :  { %12 = vsyncpa [#allocation6 + $0x1], 0  ;;  %s1883_s9 = smov 0   ;;  %s1885_s10 = smov 0  }
   0x4   :  { %s1887_s11 = smov 0   ;;  %s1889_s12 = smov 0  }
   0x5   :  { %s1891_s13 = smov 0   ;;  %s1893_s14 = smov 0  }
   0x6 LB: > { %s1588_s15 = sadd.s32 4294967295, %s1855_s14   ;;  %s1589_s16 = sadd.s32 4294967294, %s1855_s14   ;;  %s1855_s14 = sphi %s1893_s14, %s18_s14   ;;  %s1851_s13 = sphi %s1891_s13, %s2803_s13   ;;  %s1847_s12 = sphi %s1889_s12, %s2802_s12   ;;  %s1843_s11 = sphi %s1887_s11, %s2801_s11   ;;  %s1839_s10 = sphi %s1885_s10, %s2800_s10   ;;  %s1835_s9 = sphi %s1883_s9, %s2799_s9  }
   0x7   : > { %s30_s17 = sadd.s32 1, %s1851_s13  ;;  %s39_s18 = sadd.s32 1, %s1843_s11 }
   0x8   : > { %p32_p0 = scmp.ge.s32.totalorder %s30_s17, 2  ;;  %p46_p1 = scmp.ne.s32.totalorder %s1843_s11, %s1839_s10 }
   0x9   : > { %p47_p2 = scmp.eq.s32.totalorder %s1855_s14, 0  ;;  %p52_p3 = scmp.ne.s32.totalorder %s1839_s10, %s1835_s9 }
   0xa   : > { %s2805_s17 = smov (%p32_p0, %s30_s17), 0  ;;  %p53_p5 = scmp.eq.s32.totalorder %s1588_s15, 0 }
   0xb   : > { %p1924_p4 = por %p47_p2, %p46_p1  ;;  %s34_s20 = ssub.s32 %s1851_s13, %s2805_s17 }
   0xc   : > { %p104_p6 = scmp.eq.s32.totalorder %s1588_s15, 1  ;;  %p37_p7 = scmp.eq.s32.totalorder %s34_s20, 0 }
   0xd   : > { %p1930_p8 = por %p53_p5, %p52_p3  ;;  %p110_p10 = scmp.eq.s32.totalorder %s1589_s16, 1 }
   0xe   : > { %p1934_p9 = por %p104_p6, %p46_p1  ;;  %p1686_p13 = scmp.lt.s32.totalorder %s1855_s14, 2 }
   0xf   : > { %s1939_s23 = scalar_select %p37_p7, %s1843_s11, %s39_s18  }
  0x10   : > { %p1941_p11 = por %p110_p10, %p52_p3  ;;  %s138_s25 = sand.u32 1, %s1843_s11  }
  0x11   : > { %s1593_s26 = sshll.u32 %s138_s25, 6  ;;  %s1672_s27 = sshll.u32 %s1851_s13, 10 }
  0x12   : > { %s151_s30 = scalar_lea.hbm %s2788_s0, %s1672_s27  ;;  %s142_s3 = scalar_lea.vmem [#allocation4], %s1593_s26 }
  0x13   : > { %s152_s4 = sshll.u32 %s142_s3, 4  ;;  %p1954_p0 = pnand %p1686_p13, %p1924_p4  ;;  %s153_s4 = int_to_ptr.vmem [resolvable:$true] %s152_s4 }
  0x14   : > { %p1596_p1 = scmp.ge.s32.totalorder %s1855_s14, 1  ;;  %s139_s6 = scalar_lea.sflag [#allocation5], %s138_s25 }
  0x15   : > { %p1749_p2 = pneg %p1954_p0  ;;  %s1760_s7 = scalar_lea.vmem %s153_s4, 1024 }
  0x16   : > { %p1761_p3 = scmp.ne.s32.totalorder %s153_s4, %s1760_s7  ;;  %s1857_s8 = smov [#allocation4]  }
  0x17   : > { %s1765_s15 = sshll.u32 %s1857_s8, 4  ;;  %s1766_s15 = int_to_ptr.vmem [resolvable:$false] %s1765_s15 }
  0x18   : > { %p1763_p5 = pnand %p1761_p3, %p1749_p2  ;;  %s1767_s16 = scalar_lea.vmem %s1766_s15, 2048 }
  0x19   : > { %p1768_p7 = scmp.lt.s32.totalorder %s153_s4, %s1766_s15  ;;  %p1769_p10 = scmp.lt.s32.totalorder %s1767_s16, %s1760_s7 }
  0x1a   : > { %p1764_p6 = pneg %p1763_p5 }
  0x1b   : > { %p1770_p12 = por %p1769_p10, %p1768_p7 }
  0x1d   : > { %p1771_p4 = pnand %p1770_p12, %p1764_p6 }
  0x1f   : > { %1774 = shalt.err (!%p1771_p4)
}
  0x20   : > { %s1858_s18 = smov 128   ;;  %s1859_s19 = smov 8  }
  0x21   : > { %1681 = dma.hbm_to_vmem [thread:$0]  (!%p1954_p0), %s151_s30, 1024, %s153_s4, %s139_s6, %s1858_s18, %s1858_s18, %s1859_s19  }
  0x22   : > { %p160_p13 = scmp.lt.s32.totalorder %s1855_s14, 3 }
  0x24   : > { %p161_p2 = pnand %p1596_p1, %p160_p13 }
  0x25   : > { %s1967_s20 = sand.u32 (!%p161_p2), 1, %s1839_s10  }
  0x26   : > { %164 = sbr.rel (%p161_p2) target bundleno = 681 (0x2a9), region = 28  ;;  %s1597_s25 = sshll.u32 (!%p161_p2), %s1967_s20, 6 }
  0x27   : > { %s167_s26 = scalar_lea.sflag (!%p161_p2), [#allocation5], %s1967_s20  ;;  %s170_s27 = scalar_lea.vmem (!%p161_p2), [#allocation4], %s1597_s25 }
  0x2b   : > { %1826 = dma.done.wait (%p1930_p8), %s167_s26, 1024  }
  0x2c   : > { %1828 = vsyncadd (%p1930_p8), %s167_s26, 4294966272  ;;  %v204_v0 = vld [vmem:[%s170_s27 + $0x10] sm:$0xff]  ;;  %v202_v1 = vld [vmem:[%s170_s27] sm:$0xff]  ;;  %s1860_s28 = smov 1   ;;  %v1861_v8 = vmov 0   ;;  %vm242_vm0 = vcmask 138248  }
  0x2d   : > { %222 = vrot.lane.b32.xlu1 %v204_v0, %s1860_s28  ;;  %218 = vrot.lane.b32.xlu0 %v202_v1, %s1860_s28  ;;  %v205_v2 = vld [vmem:[%s170_s27 + $0x18] sm:$0xff]  ;;  %v203_v3 = vld [vmem:[%s170_s27 + $0x8] sm:$0xff]  ;;  %vm251_vm1 = vcmask 132105   ;;  %vm256_vm2 = vcmask 137230   ;;  %s1862_s21 = smov 126   ;;  %vm321_vm3 = vcmask 7168  }
  0x2e   : > { %v207_v4 = vld [vmem:[%s170_s27 + $0x28] sm:$0xff]  ;;  %v206_v5 = vld [vmem:[%s170_s27 + $0x20] sm:$0xff]  ;;  %v209_v6 = vld [vmem:[%s170_s27 + $0x38] sm:$0xff]  ;;  %1745 = vset.pattern.permute.xlu0 %v1861_v8  ;;  %1746 = vset.pattern.permute.xlu1 %v1861_v8  ;;  %vm324_vm4 = vcmask 1024   ;;  %s1863_s3 = smov 2   ;;  %vm395_vm5 = vcmask 146568  }
  0x2f   : > { %v208_v7 = vld [vmem:[%s170_s27 + $0x30] sm:$0xff]  ;;  %v1599_v26 = vld [vmem:[%s2789_s1] ss:$0 sm:$0xff]  ;;  %v1600_v28 = vld [vmem:[%s2789_s1 + $0x1] ss:$0 sm:$0xff]  ;;  %vm398_vm6 = vcmask 140424  }
  0x30   : > { %v1602_v29 = vld [vmem:[%s2789_s1 + $0x3] ss:$0 sm:$0xff]  ;;  %v1601_v30 = vld [vmem:[%s2789_s1 + $0x2] ss:$0 sm:$0xff]  ;;  %v1608_v31 = vld [vmem:[%s2789_s1 + $0x5] ss:$0 sm:$0xff] }
  0x31   : > { %224 = vrot.lane.b32.xlu1 %v205_v2, %s1860_s28  ;;  %220 = vrot.lane.b32.xlu0 %v203_v3, %s1860_s28  ;;  %v1607_v32 = vld [vmem:[%s2789_s1 + $0x4] ss:$0 sm:$0xff]  ;;  %v1610_v35 = vld [vmem:[%s2789_s1 + $0x7] ss:$0 sm:$0xff]  ;;  %vm469_vm7 = vcmask 130048   ;;  %s1864_s27 = smov 127  }
  0x32   : > { %v1609_v36 = vld [vmem:[%s2789_s1 + $0x6] ss:$0 sm:$0xff]  ;;  %v1615_v37 = vld [vmem:[%s2789_s1 + $0x8] ss:$0 sm:$0xff]  ;;  %v1616_v38 = vld [vmem:[%s2789_s1 + $0x9] ss:$0 sm:$0xff] }
  0x33   : > { %v1617_v39 = vld [vmem:[%s2789_s1 + $0xa] ss:$0 sm:$0xff]  ;;  %v1618_v40 = vld [vmem:[%s2789_s1 + $0xb] ss:$0 sm:$0xff]  ;;  %v1632_v41 = vld [vmem:[%s2789_s1 + $0x11] ss:$0 sm:$0xff] }
  0x34   : > { %v1631_v42 = vld [vmem:[%s2789_s1 + $0x10] ss:$0 sm:$0xff]  ;;  %v1634_v43 = vld [vmem:[%s2789_s1 + $0x13] ss:$0 sm:$0xff]  ;;  %v1633_v44 = vld [vmem:[%s2789_s1 + $0x12] ss:$0 sm:$0xff] }
  0x35   : > { %228 = vrot.lane.b32.xlu1 %v207_v4, %s1860_s28  ;;  %226 = vrot.lane.b32.xlu0 %v206_v5, %s1860_s28  ;;  %v1639_v1 = vld [vmem:[%s2789_s1 + $0x14] ss:$0 sm:$0xff]  ;;  %v1641_v4 = vld [vmem:[%s2789_s1 + $0x16] ss:$0 sm:$0xff]  ;;  %vm1145_vm8 = vcmask 1045504   ;;  %vm761_vm9 = vcmask 1046528  }
  0x36   : > { %s1473_s5 = scalar_lea.sflag [#allocation6], %s1967_s20 }
  0x39   : > { %232 = vrot.lane.b32.xlu1 %v209_v6, %s1860_s28  ;;  %230 = vrot.lane.b32.xlu0 %v208_v7, %s1860_s28  ;;  %v1655_v7 = vld [vmem:[%s2789_s1 + $0x1c] ss:$0 sm:$0xff] }
  0x9f   : > { %v223_v9 = vpop.permute.xlu1 %222  ;;  %v219_v10 = vpop.permute.xlu0 %218 }
  0xa0   : > { %245 = vst.msk [vmem:[#allocation2 + $0x19] sm:$0xff] %vm242_vm0, %v223_v9  ;;  %243 = vst.msk [vmem:[#allocation2 + $0x1] sm:$0xff] %vm242_vm0, %v219_v10 }
  0xa1   : > { %253 = vst.msk [vmem:[#allocation2 + $0x17] sm:$0x2] %vm251_vm1, %v223_v9  ;;  %252 = vst.msk [vmem:[#allocation2 - $0x1] sm:$0x2] %vm251_vm1, %v219_v10  ;;  %v1657_v10 = vld [vmem:[%s2789_s1 + $0x1e] ss:$0 sm:$0xff] }
  0xa3   : > { %v225_v11 = vpop.permute.xlu1 %224  ;;  %v221_v12 = vpop.permute.xlu0 %220 }
  0xa4   : > { %246 = vst.msk [vmem:[#allocation2 + $0x21] sm:$0xff] %vm242_vm0, %v225_v11  ;;  %244 = vst.msk [vmem:[#allocation2 + $0x9] sm:$0xff] %vm242_vm0, %v221_v12 }
  0xa5   : > { %258 = vst.msk [vmem:[#allocation2 + $0x23] sm:$0x40] %vm256_vm2, %v225_v11  ;;  %257 = vst.msk [vmem:[#allocation2 + $0xb] sm:$0x40] %vm256_vm2, %v221_v12  ;;  %v1663_v12 = vld [vmem:[%s2789_s1 + $0x20] ss:$0 sm:$0xff] }
  0xa7   : > { %v229_v14 = vpop.permute.xlu1 %228  ;;  %v227_v15 = vpop.permute.xlu0 %226 }
  0xa8   : > { %v261_v13 = vld [vmem:[#allocation2] sm:$0xff]  ;;  %248 = vst.msk [vmem:[#allocation2 + $0x39] sm:$0xff] %vm242_vm0, %v229_v14  ;;  %247 = vst.msk [vmem:[#allocation2 + $0x31] sm:$0xff] %vm242_vm0, %v227_v15  ;;  %v264_v21 = vld [vmem:[#allocation2 + $0x18] sm:$0xff] }
  0xa9   : > { %285 = vrot.lane.b32.xlu0 %v261_v13, %s1862_s21  ;;  %259 = vst.msk [vmem:[#allocation2 + $0x3b] sm:$0x40] %vm256_vm2, %v229_v14  ;;  %v1665_v14 = vld [vmem:[%s2789_s1 + $0x22] ss:$0 sm:$0xff] }
  0xaa   : > { %254 = vst.msk [vmem:[#allocation2 + $0x2f] sm:$0x2] %vm251_vm1, %v227_v15 }
  0xab   : > { %v262_v17 = vld [vmem:[#allocation2 + $0x8] sm:$0xff]  ;;  %v233_v18 = vpop.permute.xlu1 %232  ;;  %v231_v19 = vpop.permute.xlu0 %230  ;;  %v265_v20 = vld [vmem:[#allocation2 + $0x20] sm:$0xff] }
  0xac   : > { %v263_v16 = vld [vmem:[#allocation2 + $0x10] sm:$0x3]  ;;  %287 = vrot.lane.b32.xlu1 %v262_v17, %s1862_s21  ;;  %250 = vst.msk [vmem:[#allocation2 + $0x51] sm:$0xff] %vm242_vm0, %v233_v18  ;;  %249 = vst.msk [vmem:[#allocation2 + $0x49] sm:$0xff] %vm242_vm0, %v231_v19  ;;  %v266_v23 = vld [vmem:[#allocation2 + $0x28] sm:$0x3] }
  0xad   : > { %289 = vrot.lane.b32.xlu0 %v263_v16, %s1862_s21  ;;  %260 = vst.msk [vmem:[#allocation2 + $0x53] sm:$0x40] %vm256_vm2, %v233_v18  ;;  %v1640_v16 = vld [vmem:[%s2789_s1 + $0x15] ss:$0 sm:$0xff]  ;;  %v1623_v18 = vld [vmem:[%s2789_s1 + $0xc] ss:$0 sm:$0xff] }
  0xae   : > { %255 = vst.msk [vmem:[#allocation2 + $0x47] sm:$0x2] %vm251_vm1, %v231_v19  ;;  %v1642_v19 = vld [vmem:[%s2789_s1 + $0x17] ss:$0 sm:$0xff] }
  0xaf   : > { %v268_v25 = vld [vmem:[#allocation2 + $0x38] sm:$0xff] }
  0xb0   : > { %291 = vrot.lane.b32.xlu1 %v264_v21, %s1862_s21  ;;  %v269_v33 = vld [vmem:[#allocation2 + $0x40] sm:$0x3]  ;;  %v1656_v21 = vld [vmem:[%s2789_s1 + $0x1d] ss:$0 sm:$0xff] }
  0xb1   : > { %293 = vrot.lane.b32.xlu0 %v265_v20, %s1862_s21  ;;  %v267_v22 = vld [vmem:[#allocation2 + $0x30] sm:$0xff]  ;;  %v1625_v20 = vld [vmem:[%s2789_s1 + $0xe] ss:$0 sm:$0xff] }
  0xb3   : > { %v271_v27 = vld [vmem:[#allocation2 + $0x50] sm:$0xff] }
  0xb4   : > { %295 = vrot.lane.b32.xlu1 %v266_v23, %s1862_s21  ;;  %v272_v34 = vld [vmem:[#allocation2 + $0x58] sm:$0x3]  ;;  %v1658_v23 = vld [vmem:[%s2789_s1 + $0x1f] ss:$0 sm:$0xff] }
  0xb5   : > { %297 = vrot.lane.b32.xlu0 %v267_v22, %s1862_s21  ;;  %v270_v24 = vld [vmem:[#allocation2 + $0x48] sm:$0xff]  ;;  %v1647_v22 = vld [vmem:[%s2789_s1 + $0x18] ss:$0 sm:$0xff] }
  0xb8   : > { %299 = vrot.lane.b32.xlu1 %v268_v25, %s1862_s21  ;;  %v1664_v25 = vld [vmem:[%s2789_s1 + $0x21] ss:$0 sm:$0xff] }
  0xb9   : > { %303 = vrot.lane.b32.xlu0 %v270_v24, %s1862_s21  ;;  %v1649_v24 = vld [vmem:[%s2789_s1 + $0x1a] ss:$0 sm:$0xff] }
  0xbc   : > { %305 = vrot.lane.b32.xlu1 %v271_v27, %s1862_s21  ;;  %v1624_v27 = vld [vmem:[%s2789_s1 + $0xd] ss:$0 sm:$0xff] }
  0xbd   : > { %446 = vperm.xlu0 %1745, %v1599_v26   ;;  %v1666_v26 = vld [vmem:[%s2789_s1 + $0x23] ss:$0 sm:$0xff] }
  0xc0   : > { %450 = vperm.xlu1 %1746, %v1600_v28   ;;  %v1626_v28 = vld [vmem:[%s2789_s1 + $0xf] ss:$0 sm:$0xff] }
  0xc1   : > { %458 = vperm.xlu0 %1745, %v1602_v29   ;;  %v1648_v29 = vld [vmem:[%s2789_s1 + $0x19] ss:$0 sm:$0xff] }
  0xc4   : > { %454 = vperm.xlu1 %1746, %v1601_v30   ;;  %v1650_v30 = vld [vmem:[%s2789_s1 + $0x1b] ss:$0 sm:$0xff] }
  0xc5   : > { %516 = vperm.xlu0 %1745, %v1608_v31  }
  0xc8   : > { %512 = vperm.xlu1 %1746, %v1607_v32  }
  0xc9   : > { %301 = vrot.lane.b32.xlu0 %v269_v33, %s1862_s21 }
  0xcc   : > { %307 = vrot.lane.b32.xlu1 %v272_v34, %s1862_s21 }
  0xcd   : > { %524 = vperm.xlu0 %1745, %v1610_v35  }
  0xd0   : > { %520 = vperm.xlu1 %1746, %v1609_v36  }
  0xd1   : > { %617 = vperm.xlu0 %1745, %v1615_v37  }
  0xd4   : > { %621 = vperm.xlu1 %1746, %v1616_v38  }
  0xd5   : > { %625 = vperm.xlu0 %1745, %v1617_v39  }
  0xd8   : > { %629 = vperm.xlu1 %1746, %v1618_v40  }
  0xd9   : > { %844 = vperm.xlu0 %1745, %v1632_v41  }
  0xdc   : > { %840 = vperm.xlu1 %1746, %v1631_v42  }
  0xdd   : > { %852 = vperm.xlu0 %1745, %v1634_v43  }
  0xe0   : > { %848 = vperm.xlu1 %1746, %v1633_v44  }
 0x11b   : > { %v286_v45 = vpop.permute.xlu0 %285 }
 0x11c   : > { %322 = vst.msk [vmem:[#allocation2] sm:$0xff] %vm321_vm3, %v286_v45 }
 0x11e   : > { %v288_v46 = vpop.permute.xlu1 %287 }
 0x11f   : > { %v290_v47 = vpop.permute.xlu0 %289  ;;  %323 = vst.msk [vmem:[#allocation2 + $0x8] sm:$0xff] %vm321_vm3, %v288_v46 }
 0x120   : > { %325 = vst.msk [vmem:[#allocation2 + $0x10] sm:$0x3] %vm324_vm4, %v290_v47 }
 0x122   : > { %v292_v48 = vpop.permute.xlu1 %291 }
 0x123   : > { %v294_v49 = vpop.permute.xlu0 %293  ;;  %v335_v50 = vld [vmem:[#allocation2] sm:$0xff]  ;;  %326 = vst.msk [vmem:[#allocation2 + $0x18] sm:$0xff] %vm321_vm3, %v292_v48 }
 0x124   : > { %327 = vst.msk [vmem:[#allocation2 + $0x20] sm:$0xff] %vm321_vm3, %v294_v49  ;;  %359 = vrot.lane.b32.xlu0 %v335_v50, %s1863_s3 }
 0x126   : > { %v296_v51 = vpop.permute.xlu1 %295  ;;  %v336_v53 = vld [vmem:[#allocation2 + $0x8] sm:$0xff] }
 0x127   : > { %v298_v52 = vpop.permute.xlu0 %297  ;;  %v337_v54 = vld [vmem:[#allocation2 + $0x10] sm:$0x3]  ;;  %328 = vst.msk [vmem:[#allocation2 + $0x28] sm:$0x3] %vm324_vm4, %v296_v51  ;;  %361 = vrot.lane.b32.xlu1 %v336_v53, %s1863_s3 }
 0x128   : > { %329 = vst.msk [vmem:[#allocation2 + $0x30] sm:$0xff] %vm321_vm3, %v298_v52  ;;  %363 = vrot.lane.b32.xlu0 %v337_v54, %s1863_s3 }
 0x12a   : > { %v300_v55 = vpop.permute.xlu1 %299  ;;  %v338_v57 = vld [vmem:[#allocation2 + $0x18] sm:$0xff] }
 0x12b   : > { %v304_v56 = vpop.permute.xlu0 %303  ;;  %v339_v58 = vld [vmem:[#allocation2 + $0x20] sm:$0xff]  ;;  %330 = vst.msk [vmem:[#allocation2 + $0x38] sm:$0xff] %vm321_vm3, %v300_v55  ;;  %365 = vrot.lane.b32.xlu1 %v338_v57, %s1863_s3 }
 0x12c   : > { %332 = vst.msk [vmem:[#allocation2 + $0x48] sm:$0xff] %vm321_vm3, %v304_v56  ;;  %367 = vrot.lane.b32.xlu0 %v339_v58, %s1863_s3 }
 0x12e   : > { %v306_v59 = vpop.permute.xlu1 %305  ;;  %v340_v60 = vld [vmem:[#allocation2 + $0x28] sm:$0x3] }
 0x12f   : > { %v341_v61 = vld [vmem:[#allocation2 + $0x30] sm:$0xff]  ;;  %333 = vst.msk [vmem:[#allocation2 + $0x50] sm:$0xff] %vm321_vm3, %v306_v59  ;;  %369 = vrot.lane.b32.xlu1 %v340_v60, %s1863_s3 }
 0x130   : > { %371 = vrot.lane.b32.xlu0 %v341_v61, %s1863_s3 }
 0x132   : > { %v342_v62 = vld [vmem:[#allocation2 + $0x38] sm:$0xff] }
 0x133   : > { %373 = vrot.lane.b32.xlu1 %v342_v62, %s1863_s3  ;;  %v344_v63 = vld [vmem:[#allocation2 + $0x48] sm:$0xff] }
 0x136   : > { %v345_v15 = vld [vmem:[#allocation2 + $0x50] sm:$0xff] }
 0x137   : > { %377 = vrot.lane.b32.xlu1 %v344_v63, %s1863_s3 }
 0x138   : > { %v2072_v0 = vpop.permute.xlu0 %446 }
 0x13b   : > { %v2077_v2 = vpop.permute.xlu1 %450  ;;  %973 = vperm.xlu1 %1746, %v1639_v1  }
 0x13c   : > { %v2079_v3 = vpop.permute.xlu0 %458 }
 0x13f   : > { %v2084_v5 = vpop.permute.xlu1 %454  ;;  %981 = vperm.xlu1 %1746, %v1641_v4  }
 0x140   : > { %v2086_v6 = vpop.permute.xlu0 %516 }
 0x143   : > { %v2091_v8 = vpop.permute.xlu1 %512  ;;  %1224 = vperm.xlu1 %1746, %v1655_v7  }
 0x144   : > { %v302_v9 = vpop.permute.xlu0 %301 }
 0x145   : > { %331 = vst.msk [vmem:[#allocation2 + $0x40] sm:$0x3] %vm324_vm4, %v302_v9 }
 0x147   : > { %v308_v11 = vpop.permute.xlu1 %307  ;;  %1232 = vperm.xlu1 %1746, %v1657_v10  }
 0x148   : > { %334 = vst.msk [vmem:[#allocation2 + $0x58] sm:$0x3] %vm324_vm4, %v308_v11  ;;  %v2149_v31 = vpop.permute.xlu0 %524 }
 0x14b   : > { %1357 = vperm.xlu1 %1746, %v1663_v12   ;;  %v521_v32 = vpop.permute.xlu1 %520 }
 0x14c   : > { %v343_v13 = vld [vmem:[#allocation2 + $0x40] sm:$0x3]  ;;  %v2151_v33 = vpop.permute.xlu0 %617 }
 0x14d   : > { %375 = vrot.lane.b32.xlu0 %v343_v13, %s1863_s3 }
 0x14f   : > { %1365 = vperm.xlu1 %1746, %v1665_v14   ;;  %v346_v17 = vld [vmem:[#allocation2 + $0x58] sm:$0x3]  ;;  %v2153_v34 = vpop.permute.xlu1 %621 }
 0x150   : > { %v2155_v35 = vpop.permute.xlu0 %625 }
 0x151   : > { %379 = vrot.lane.b32.xlu0 %v345_v15, %s1863_s3 }
 0x153   : > { %381 = vrot.lane.b32.xlu1 %v346_v17, %s1863_s3  ;;  %v2157_v36 = vpop.permute.xlu1 %629 }
 0x154   : > { %v2159_v37 = vpop.permute.xlu0 %844 }
 0x155   : > { %977 = vperm.xlu0 %1745, %v1640_v16  }
 0x157   : > { %722 = vperm.xlu1 %1746, %v1623_v18   ;;  %v2161_v38 = vpop.permute.xlu1 %840 }
 0x158   : > { %v2163_v39 = vpop.permute.xlu0 %852 }
 0x159   : > { %985 = vperm.xlu0 %1745, %v1642_v19  }
 0x15b   : > { %730 = vperm.xlu1 %1746, %v1625_v20   ;;  %v2165_v40 = vpop.permute.xlu1 %848 }
 0x15d   : > { %1228 = vperm.xlu0 %1745, %v1656_v21  }
 0x15f   : > { %1106 = vperm.xlu1 %1746, %v1647_v22  }
 0x161   : > { %1236 = vperm.xlu0 %1745, %v1658_v23  }
 0x163   : > { %1114 = vperm.xlu1 %1746, %v1649_v24  }
 0x165   : > { %1361 = vperm.xlu0 %1745, %v1664_v25  }
 0x169   : > { %1369 = vperm.xlu0 %1745, %v1666_v26  }
 0x16d   : > { %726 = vperm.xlu0 %1745, %v1624_v27  }
 0x171   : > { %734 = vperm.xlu0 %1745, %v1626_v28  }
 0x175   : > { %1110 = vperm.xlu0 %1745, %v1648_v29  }
 0x179   : > { %1118 = vperm.xlu0 %1745, %v1650_v30  }
 0x196   : > { %v360_v41 = vpop.permute.xlu0 %359 }
 0x197   : > { %396 = vst.msk [vmem:[#allocation2] sm:$0xff] %vm395_vm5, %v360_v41 }
 0x199   : > { %v362_v42 = vpop.permute.xlu1 %361 }
 0x19a   : > { %v364_v43 = vpop.permute.xlu0 %363  ;;  %397 = vst.msk [vmem:[#allocation2 + $0x8] sm:$0xff] %vm395_vm5, %v362_v42 }
 0x19b   : > { %399 = vst.msk [vmem:[#allocation2 + $0x10] sm:$0x3] %vm398_vm6, %v364_v43 }
 0x19d   : > { %v366_v44 = vpop.permute.xlu1 %365 }
 0x19e   : > { %v368_v45 = vpop.permute.xlu0 %367  ;;  %v2170_v46 = vld [vmem:[#allocation2] sm:$0xff]  ;;  %400 = vst.msk [vmem:[#allocation2 + $0x18] sm:$0xff] %vm395_vm5, %v366_v44 }
 0x19f   : > { %401 = vst.msk [vmem:[#allocation2 + $0x20] sm:$0xff] %vm395_vm5, %v368_v45  ;;  %v527_v47 = vmul.f32 %v2091_v8, %v2170_v46  ;;  %v461_v48 = vmul.f32 %v2072_v0, %v2170_v46  ;;  %v855_v20 = vmul.f32 %v2161_v38, %v2170_v46 }
 0x1a1   : > { %543 = vrot.lane.b32.xlu1 %v527_v47, %s1864_s27  ;;  %470 = vst.msk [vmem:[#allocation3] sm:$0xff] %vm469_vm7, %v461_v48  ;;  %v370_v49 = vpop.permute.xlu1 %369  ;;  %v2180_v51 = vld [vmem:[#allocation2 + $0x8] sm:$0xff]  ;;  %v879_v28 = vrot.slane %v855_v20, 1 }
 0x1a2   : > { %v372_v50 = vpop.permute.xlu0 %371  ;;  %402 = vst.msk [vmem:[#allocation2 + $0x28] sm:$0x3] %vm398_vm6, %v370_v49  ;;  %v528_v52 = vmul.f32 %v2091_v8, %v2180_v51  ;;  %v462_v53 = vmul.f32 %v2072_v0, %v2180_v51  ;;  %v2253_v17 = vmul.f32 %v2161_v38, %v2180_v51  ;;  %v2277_v29 = vld [vmem:[#allocation2 + $0x10] sm:$0x3] }
 0x1a3   : > { %403 = vst.msk [vmem:[#allocation2 + $0x30] sm:$0xff] %vm395_vm5, %v372_v50 }
 0x1a4   : > { %545 = vrot.lane.b32.xlu0 %v528_v52, %s1864_s27  ;;  %471 = vst.msk [vmem:[#allocation3 + $0x8] sm:$0xff] %vm469_vm7, %v462_v53  ;;  %v880_v26 = vrot.slane %v2253_v17, 1 }
 0x1a5   : > { %v374_v54 = vpop.permute.xlu1 %373  ;;  %v2189_v55 = vld [vmem:[#allocation2 + $0x18] sm:$0xff] }
 0x1a6   : > { %v2191_v56 = vld [vmem:[#allocation2 + $0x20] sm:$0xff]  ;;  %404 = vst.msk [vmem:[#allocation2 + $0x38] sm:$0xff] %vm395_vm5, %v374_v54  ;;  %v529_v57 = vmul.f32 %v2086_v6, %v2189_v55  ;;  %v463_v59 = vmul.f32 %v2077_v2, %v2189_v55  ;;  %v634_v11 = vmul.f32 %v2153_v34, %v2189_v55  ;;  %v858_v24 = vmul.f32 %v2159_v37, %v2189_v55 }
 0x1a7   : > { %v530_v58 = vmul.f32 %v2086_v6, %v2191_v56  ;;  %v464_v60 = vmul.f32 %v2077_v2, %v2191_v56  ;;  %v2267_v25 = vmul.f32 %v2159_v37, %v2191_v56  ;;  %v881_v47 = vsel %vm761_vm9, %v879_v28, %v880_v26 }
 0x1a8   : > { %547 = vrot.lane.b32.xlu1 %v529_v57, %s1864_s27  ;;  %472 = vst.msk [vmem:[#allocation3 + $0x10] sm:$0xff] %vm469_vm7, %v463_v59 }
 0x1a9   : > { %549 = vrot.lane.b32.xlu0 %v530_v58, %s1864_s27  ;;  %v378_v61 = vpop.permute.xlu1 %377  ;;  %473 = vst.msk [vmem:[#allocation3 + $0x18] sm:$0xff] %vm469_vm7, %v464_v60  ;;  %v885_v41 = vrot.slane %v2267_v25, 1 }
 0x1aa   : > { %v2205_v62 = vld [vmem:[#allocation2 + $0x30] sm:$0xff]  ;;  %406 = vst.msk [vmem:[#allocation2 + $0x48] sm:$0xff] %vm395_vm5, %v378_v61 }
 0x1ab   : > { %v531_v63 = vmul.f32 %v521_v32, %v2205_v62  ;;  %v465_v0 = vmul.f32 %v2084_v5, %v2205_v62  ;;  %v636_v14 = vmul.f32 %v2155_v35, %v2205_v62  ;;  %v861_v48 = vmul.f32 %v2165_v40, %v2205_v62 }
 0x1ad   : > { %551 = vrot.lane.b32.xlu1 %v531_v63, %s1864_s27  ;;  %v2214_v1 = vld [vmem:[#allocation2 + $0x38] sm:$0xff]  ;;  %474 = vst.msk [vmem:[#allocation3 + $0x20] sm:$0xff] %vm469_vm7, %v465_v0 }
 0x1ae   : > { %v532_v2 = vmul.f32 %v521_v32, %v2214_v1  ;;  %v466_v4 = vmul.f32 %v2084_v5, %v2214_v1  ;;  %v632_v5 = vmul.f32 %v2151_v33, %v2170_v46  ;;  %v884_v32 = vrot.slane %v858_v24, 1 }
 0x1af   : > { %v2282_v42 = vmul.f32 %v2165_v40, %v2214_v1 }
 0x1b0   : > { %553 = vrot.lane.b32.xlu0 %v532_v2, %s1864_s27  ;;  %475 = vst.msk [vmem:[#allocation3 + $0x28] sm:$0xff] %vm469_vm7, %v466_v4  ;;  %v886_v57 = vsel %vm761_vm9, %v884_v32, %v885_v41  ;;  %v889_v2 = vrot.slane %v861_v48, 1  ;;  %v633_v4 = vmul.f32 %v2151_v33, %v2180_v51  ;;  %v635_v32 = vmul.f32 %v2153_v34, %v2191_v56 }
 0x1b1   : > { %v2221_v6 = vld [vmem:[#allocation2 + $0x48] sm:$0xff]  ;;  %v890_v59 = vrot.slane %v2282_v42, 1 }
 0x1b2   : > { %v533_v7 = vmul.f32 %v2149_v31, %v2221_v6  ;;  %v467_v8 = vmul.f32 %v2079_v3, %v2221_v6  ;;  %v638_v23 = vmul.f32 %v2157_v36, %v2221_v6 }
 0x1b4   : > { %555 = vrot.lane.b32.xlu1 %v533_v7, %s1864_s27  ;;  %476 = vst.msk [vmem:[#allocation3 + $0x30] sm:$0xff] %vm469_vm7, %v467_v8 }
 0x1b6   : > { %v2230_v9 = vpop.permute.xlu1 %973 }
 0x1b7   : > { %v2323_v33 = vmul.f32 %v2230_v9, %v2180_v51 }
 0x1b8   : > { %648 = vrot.lane.b32.xlu1 %v632_v5, %s1862_s21 }
 0x1ba   : > { %v2235_v10 = vpop.permute.xlu1 %981 }
 0x1bc   : > { %652 = vrot.lane.b32.xlu1 %v634_v11, %s1862_s21 }
 0x1be   : > { %v2240_v12 = vpop.permute.xlu1 %1224 }
 0x1bf   : > { %v376_v13 = vpop.permute.xlu0 %375  ;;  %v1239_v15 = vmul.f32 %v2240_v12, %v2170_v46  ;;  %v2248_v16 = vmul.f32 %v2240_v12, %v2180_v51 }
 0x1c0   : > { %405 = vst.msk [vmem:[#allocation2 + $0x40] sm:$0x3] %vm398_vm6, %v376_v13  ;;  %656 = vrot.lane.b32.xlu1 %v636_v14, %s1862_s21  ;;  %v988_v14 = vmul.f32 %v2230_v9, %v2170_v46 }
 0x1c1   : > { %v1263_v18 = vrot.slane %v1239_v15, 2  ;;  %v2791_v19 = vrot.slane %v2248_v16, 2 }
 0x1c2   : > { %v2259_v21 = vpop.permute.xlu1 %1232 }
 0x1c3   : > { %v380_v22 = vpop.permute.xlu0 %379  ;;  %v2274_v27 = vsel %vm1145_vm8, %v1263_v18, %v2791_v19 }
 0x1c4   : > { %407 = vst.msk [vmem:[#allocation2 + $0x50] sm:$0xff] %vm395_vm5, %v380_v22  ;;  %660 = vrot.lane.b32.xlu1 %v638_v23, %s1862_s21  ;;  %v891_v23 = vsel %vm761_vm9, %v889_v2, %v890_v59 }
 0x1c6   : > { %v1358_v30 = vpop.permute.xlu1 %1357 }
 0x1c7   : > { %v1372_v43 = vmul.f32 %v1358_v30, %v2170_v46  ;;  %v1373_v44 = vmul.f32 %v1358_v30, %v2180_v51  ;;  %v1374_v45 = vmul.f32 %v1358_v30, %v2277_v29  ;;  %v2293_v52 = vld [vmem:[#allocation2 + $0x40] sm:$0x3] }
 0x1c8   : > { %899 = vrot.lane.b32.xlu1 %v881_v47, %s1864_s27 }
 0x1c9   : > { %v1396_v49 = vrot.slane %v1372_v43, 2  ;;  %v1397_v50 = vrot.slane %v1373_v44, 2  ;;  %v1399_v53 = vrot.slane %v1374_v45, 2  ;;  %v1012_v43 = vrot.slane %v988_v14, 1 }
 0x1ca   : > { %v1366_v54 = vpop.permute.xlu1 %1365  ;;  %v1013_v44 = vrot.slane %v2323_v33, 1 }
 0x1cb   : > { %v2298_v58 = vld [vmem:[#allocation2 + $0x50] sm:$0xff]  ;;  %v1378_v60 = vmul.f32 %v1366_v54, %v2205_v62  ;;  %v1379_v61 = vmul.f32 %v1366_v54, %v2214_v1  ;;  %v1380_v63 = vmul.f32 %v1366_v54, %v2293_v52  ;;  %v2314_v8 = vsel %vm1145_vm8, %v1396_v49, %v1397_v50 }
 0x1cc   : > { %v534_v0 = vmul.f32 %v2149_v31, %v2298_v58  ;;  %903 = vrot.lane.b32.xlu1 %v886_v57, %s1864_s27  ;;  %v2311_v7 = vmul.f32 %v2163_v39, %v2298_v58  ;;  %v864_v31 = vmul.f32 %v2163_v39, %v2221_v6  ;;  %v2326_v18 = vsel %vm1145_vm8, %v1397_v50, %v1399_v53 }
 0x1cd   : > { %v1406_v5 = vrot.slane %v1378_v60, 2  ;;  %v1407_v11 = vrot.slane %v1379_v61, 2  ;;  %v1409_v13 = vrot.slane %v1380_v63, 2  ;;  %v468_v20 = vmul.f32 %v2079_v3, %v2298_v58  ;;  %v2370_v61 = vld [vmem:[#allocation2 + $0x28] sm:$0x3] }
 0x1ce   : > { %557 = vrot.lane.b32.xlu0 %v534_v0, %s1864_s27  ;;  %v382_v15 = vpop.permute.xlu1 %381  ;;  %v895_v24 = vrot.slane %v2311_v7, 1  ;;  %v894_v3 = vrot.slane %v864_v31, 1  ;;  %v994_v57 = vmul.f32 %v2235_v10, %v2205_v62  ;;  %v2368_v60 = vmul.f32 %v2235_v10, %v2214_v1 }
 0x1cf   : > { %408 = vst.msk [vmem:[#allocation2 + $0x58] sm:$0x3] %vm398_vm6, %v382_v15  ;;  %v2338_v28 = vsel %vm1145_vm8, %v1406_v5, %v1407_v11  ;;  %v2341_v30 = vsel %vm1145_vm8, %v1407_v11, %v1409_v13  ;;  %v1014_v11 = vsel %vm761_vm9, %v1012_v43, %v1013_v44  ;;  %v637_v13 = vmul.f32 %v2155_v35, %v2214_v1 }
 0x1d0   : > { %v2331_v22 = vpop.permute.xlu0 %977  ;;  %907 = vrot.lane.b32.xlu1 %v891_v23, %s1864_s27  ;;  %477 = vst.msk [vmem:[#allocation3 + $0x38] sm:$0xff] %vm469_vm7, %v468_v20  ;;  %v896_v34 = vsel %vm761_vm9, %v894_v3, %v895_v24  ;;  %v857_v35 = vmul.f32 %v2161_v38, %v2277_v29  ;;  %v860_v43 = vmul.f32 %v2159_v37, %v2370_v61 }
 0x1d1   : > { %v991_v45 = vmul.f32 %v2331_v22, %v2189_v55  ;;  %v2353_v47 = vmul.f32 %v2331_v22, %v2191_v56 }
 0x1d2   : > { %650 = vrot.lane.b32.xlu0 %v633_v4, %s1862_s21  ;;  %v723_v48 = vpop.permute.xlu1 %722  ;;  %v887_v19 = vrot.slane %v860_v43, 1 }
 0x1d3   : > { %v737_v49 = vmul.f32 %v723_v48, %v2170_v46  ;;  %v738_v50 = vmul.f32 %v723_v48, %v2180_v51  ;;  %v739_v53 = vmul.f32 %v723_v48, %v2277_v29  ;;  %v1017_v4 = vrot.slane %v991_v45, 1 }
 0x1d4   : > { %v2358_v54 = vpop.permute.xlu0 %985  ;;  %911 = vrot.lane.b32.xlu1 %v896_v34, %s1864_s27  ;;  %v1018_v31 = vrot.slane %v2353_v47, 1  ;;  %v1022_v45 = vrot.slane %v994_v57, 1  ;;  %v1023_v48 = vrot.slane %v2368_v60, 1 }
 0x1d5   : > { %v762_v63 = vrot.slane %v737_v49, 1  ;;  %v763_v0 = vrot.slane %v738_v50, 1  ;;  %v765_v2 = vrot.slane %v739_v53, 1  ;;  %v639_v50 = vmul.f32 %v2157_v36, %v2298_v58 }
 0x1d6   : > { %654 = vrot.lane.b32.xlu0 %v635_v32, %s1862_s21  ;;  %v731_v5 = vpop.permute.xlu1 %730  ;;  %v997_v53 = vmul.f32 %v2358_v54, %v2221_v6  ;;  %v2403_v34 = vmul.f32 %v2358_v54, %v2298_v58  ;;  %v1019_v36 = vsel %vm761_vm9, %v1017_v4, %v1018_v31  ;;  %v1024_v4 = vsel %vm761_vm9, %v1022_v45, %v1023_v48 }
 0x1d7   : > { %v2380_v14 = vsel %vm761_vm9, %v762_v63, %v763_v0  ;;  %v2383_v15 = vsel %vm761_vm9, %v763_v0, %v765_v2  ;;  %v743_v20 = vmul.f32 %v731_v5, %v2205_v62  ;;  %v744_v3 = vmul.f32 %v731_v5, %v2214_v1 }
 0x1d8   : > { %v2386_v23 = vpop.permute.xlu0 %1228  ;;  %v745_v32 = vmul.f32 %v731_v5, %v2293_v52  ;;  %1032 = vrot.lane.b32.xlu1 %v1014_v11, %s1862_s21  ;;  %v863_v45 = vmul.f32 %v2165_v40, %v2293_v52 }
 0x1d9   : > { %v772_v49 = vrot.slane %v743_v20, 1  ;;  %v773_v38 = vrot.slane %v744_v3, 1  ;;  %v882_v20 = vrot.slane %v857_v35, 1 }
 0x1da   : > { %658 = vrot.lane.b32.xlu0 %v637_v13, %s1862_s21  ;;  %v775_v63 = vrot.slane %v745_v32, 1  ;;  %v1107_v0 = vpop.permute.xlu1 %1106  ;;  %v1027_v32 = vrot.slane %v997_v53, 1 }
 0x1db   : > { %v1121_v37 = vmul.f32 %v1107_v0, %v2170_v46  ;;  %v1122_v57 = vmul.f32 %v1107_v0, %v2180_v51  ;;  %v1123_v2 = vmul.f32 %v1107_v0, %v2277_v29  ;;  %v2414_v11 = vsel %vm761_vm9, %v772_v49, %v773_v38 }
 0x1dc   : > { %v2408_v5 = vpop.permute.xlu0 %1236  ;;  %v2417_v13 = vsel %vm761_vm9, %v773_v38, %v775_v63  ;;  %1036 = vrot.lane.b32.xlu1 %v1019_v36, %s1862_s21  ;;  %v1028_v49 = vrot.slane %v2403_v34, 1  ;;  %v883_v43 = vsel %vm761_vm9, %v880_v26, %v882_v20  ;;  %v888_v26 = vsel %vm761_vm9, %v885_v41, %v887_v19 }
 0x1dd   : > { %v1146_v46 = vrot.slane %v1121_v37, 2  ;;  %v1147_v3 = vrot.slane %v1122_v57, 2  ;;  %v1149_v51 = vrot.slane %v1123_v2, 2  ;;  %v2442_v57 = vld [vmem:[#allocation2 + $0x58] sm:$0x3]  ;;  %v2473_v19 = vmul.f32 %v2259_v21, %v2214_v1 }
 0x1de   : > { %662 = vrot.lane.b32.xlu0 %v639_v50, %s1862_s21  ;;  %v1115_v0 = vpop.permute.xlu1 %1114  ;;  %v1029_v40 = vsel %vm761_vm9, %v1027_v32, %v1028_v49  ;;  %v1245_v32 = vmul.f32 %v2259_v21, %v2205_v62  ;;  %v999_v33 = vmul.f32 %v2358_v54, %v2442_v57 }
 0x1df   : > { %v2426_v38 = vsel %vm1145_vm8, %v1146_v46, %v1147_v3  ;;  %v2429_v63 = vsel %vm1145_vm8, %v1147_v3, %v1149_v51  ;;  %v1127_v35 = vmul.f32 %v1115_v0, %v2205_v62  ;;  %v1128_v50 = vmul.f32 %v1115_v0, %v2214_v1 }
 0x1e0   : > { %v2432_v37 = vpop.permute.xlu0 %1361  ;;  %v1129_v53 = vmul.f32 %v1115_v0, %v2293_v52  ;;  %1040 = vrot.lane.b32.xlu1 %v1024_v4, %s1862_s21  ;;  %v1242_v3 = vmul.f32 %v2386_v23, %v2189_v55  ;;  %v2449_v51 = vmul.f32 %v2386_v23, %v2191_v56  ;;  %v892_v4 = vrot.slane %v863_v45, 1 }
 0x1e1   : > { %v1156_v2 = vrot.slane %v1127_v35, 2  ;;  %v1157_v36 = vrot.slane %v1128_v50, 2  ;;  %v866_v35 = vmul.f32 %v2163_v39, %v2442_v57  ;;  %v1273_v1 = vrot.slane %v1245_v32, 2 }
 0x1e2   : > { %901 = vrot.lane.b32.xlu0 %v883_v43, %s1864_s27  ;;  %v1159_v46 = vrot.slane %v1129_v53, 2  ;;  %v1268_v25 = vrot.slane %v1242_v3, 2  ;;  %v1269_v41 = vrot.slane %v2449_v51, 2  ;;  %v990_v53 = vmul.f32 %v2230_v9, %v2277_v29 }
 0x1e3   : > { %v2460_v20 = vsel %vm1145_vm8, %v1156_v2, %v1157_v36  ;;  %v893_v39 = vsel %vm761_vm9, %v890_v59, %v892_v4  ;;  %v897_v62 = vrot.slane %v866_v35, 1  ;;  %v993_v43 = vmul.f32 %v2331_v22, %v2370_v61 }
 0x1e4   : > { %v2451_v17 = vpop.permute.xlu0 %1369  ;;  %v2463_v0 = vsel %vm1145_vm8, %v1157_v36, %v1159_v46  ;;  %1044 = vrot.lane.b32.xlu1 %v1029_v40, %s1862_s21  ;;  %v1274_v45 = vrot.slane %v2473_v19, 2  ;;  %v1248_v2 = vmul.f32 %v2408_v5, %v2221_v6  ;;  %v2493_v9 = vmul.f32 %v2408_v5, %v2298_v58 }
 0x1e5   : > { %v1270_v42 = vsel %vm1145_vm8, %v1268_v25, %v1269_v41  ;;  %v1015_v59 = vrot.slane %v990_v53, 1  ;;  %v898_v22 = vsel %vm761_vm9, %v895_v24, %v897_v62  ;;  %v996_v3 = vmul.f32 %v2235_v10, %v2293_v52 }
 0x1e6   : > { %905 = vrot.lane.b32.xlu0 %v888_v26, %s1864_s27  ;;  %v1020_v40 = vrot.slane %v993_v43, 1  ;;  %v1278_v4 = vrot.slane %v1248_v2, 2  ;;  %v1279_v35 = vrot.slane %v2493_v9, 2  ;;  %v1275_v7 = vsel %vm1145_vm8, %v1273_v1, %v1274_v45 }
 0x1e7   : > { %v1016_v10 = vsel %vm761_vm9, %v1013_v44, %v1015_v59  ;;  %v1025_v1 = vrot.slane %v996_v3, 1  ;;  %v1375_v44 = vmul.f32 %v2432_v37, %v2189_v55  ;;  %v1376_v59 = vmul.f32 %v2432_v37, %v2191_v56 }
 0x1e8   : > { %v2476_v50 = vpop.permute.xlu0 %726  ;;  %1283 = vrot.lane.b32.xlu1 %v2274_v27, %s1864_s27  ;;  %v1280_v3 = vsel %vm1145_vm8, %v1278_v4, %v1279_v35 }
 0x1e9   : > { %v1402_v4 = vrot.slane %v1376_v59, 2  ;;  %v2797_v59 = vrot.slane %v2248_v16, 2 }
 0x1ea   : > { %909 = vrot.lane.b32.xlu0 %v893_v39, %s1864_s27 }
 0x1ec   : > { %v2495_v27 = vpop.permute.xlu0 %734  ;;  %1287 = vrot.lane.b32.xlu1 %v1270_v42, %s1864_s27 }
 0x1ed   : > { %v2502_v36 = vmul.f32 %v2495_v27, %v2298_v58  ;;  %v748_v46 = vmul.f32 %v2495_v27, %v2442_v57 }
 0x1ee   : > { %913 = vrot.lane.b32.xlu0 %v898_v22, %s1864_s27  ;;  %v1021_v22 = vsel %vm761_vm9, %v1018_v31, %v1020_v40 }
 0x1ef   : > { %v778_v26 = vrot.slane %v2502_v36, 1  ;;  %v780_v32 = vrot.slane %v748_v46, 1 }
 0x1f0   : > { %v1111_v25 = vpop.permute.xlu0 %1110  ;;  %1291 = vrot.lane.b32.xlu1 %v1275_v7, %s1864_s27 }
 0x1f1   : > { %v1124_v24 = vmul.f32 %v1111_v25, %v2189_v55  ;;  %v1125_v53 = vmul.f32 %v1111_v25, %v2191_v56  ;;  %v1126_v39 = vmul.f32 %v1111_v25, %v2370_v61  ;;  %v2528_v62 = vsel %vm761_vm9, %v778_v26, %v780_v32 }
 0x1f2   : > { %1034 = vrot.lane.b32.xlu0 %v1016_v10, %s1862_s21  ;;  %v1030_v10 = vrot.slane %v999_v33, 1 }
 0x1f3   : > { %v1151_v43 = vrot.slane %v1124_v24, 2  ;;  %v1152_v2 = vrot.slane %v1125_v53, 2  ;;  %v1154_v42 = vrot.slane %v1126_v39, 2  ;;  %v1401_v24 = vrot.slane %v1375_v44, 2 }
 0x1f4   : > { %v1119_v46 = vpop.permute.xlu0 %1118  ;;  %1295 = vrot.lane.b32.xlu1 %v1280_v3, %s1864_s27  ;;  %v1241_v39 = vmul.f32 %v2240_v12, %v2277_v29  ;;  %v1382_v12 = vmul.f32 %v2451_v17, %v2298_v58  ;;  %v1031_v60 = vsel %vm761_vm9, %v1028_v49, %v1030_v10  ;;  %v1247_v44 = vmul.f32 %v2259_v21, %v2293_v52  ;;  %v478_v3 = vld [vmem:[#allocation3] sm:$0xff] }
 0x1f5   : > { %v2544_v32 = vsel %vm1145_vm8, %v1151_v43, %v1152_v2  ;;  %v2547_v47 = vsel %vm1145_vm8, %v1152_v2, %v1154_v42  ;;  %v1130_v31 = vmul.f32 %v1119_v46, %v2221_v6  ;;  %v1131_v54 = vmul.f32 %v1119_v46, %v2298_v58 }
 0x1f6   : > { %v1132_v40 = vmul.f32 %v1119_v46, %v2442_v57  ;;  %1038 = vrot.lane.b32.xlu0 %v1021_v22, %s1862_s21  ;;  %v1026_v2 = vsel %vm761_vm9, %v1023_v48, %v1025_v1  ;;  %v1381_v22 = vmul.f32 %v2451_v17, %v2221_v6  ;;  %v1403_v29 = vsel %vm1145_vm8, %v1401_v24, %v1402_v4 }
 0x1f7   : > { %v1161_v25 = vrot.slane %v1130_v31, 2  ;;  %v1162_v7 = vrot.slane %v1131_v54, 2  ;;  %v1266_v33 = vrot.slane %v1241_v39, 2  ;;  %v1412_v1 = vrot.slane %v1382_v12, 2 }
 0x1f8   : > { %v1164_v53 = vrot.slane %v1132_v40, 2  ;;  %1416 = vrot.lane.b32.xlu1 %v2314_v8, %s1862_s21  ;;  %v1244_v8 = vmul.f32 %v2386_v23, %v2370_v61  ;;  %v1411_v48 = vrot.slane %v1381_v22, 2  ;;  %v1276_v49 = vrot.slane %v1247_v44, 2  ;;  %v484_v22 = vld [vmem:[#allocation3 + $0x30] sm:$0xff] }
 0x1f9   : > { %v2557_v43 = vsel %vm1145_vm8, %v1161_v25, %v1162_v7  ;;  %v1267_v23 = vsel %vm1145_vm8, %v2797_v59, %v1266_v33  ;;  %v1250_v46 = vmul.f32 %v2408_v5, %v2442_v57  ;;  %v481_v25 = vld [vmem:[#allocation3 + $0x18] sm:$0xff]  ;;  %v2628_v59 = vmul.f32 %v2476_v50, %v2191_v56 }
 0x1fa   : > { %v2565_v42 = vsel %vm1145_vm8, %v1162_v7, %v1164_v53  ;;  %1042 = vrot.lane.b32.xlu0 %v1026_v2, %s1862_s21  ;;  %v1271_v58 = vrot.slane %v1244_v8, 2  ;;  %v1413_v34 = vsel %vm1145_vm8, %v1411_v48, %v1412_v1  ;;  %v1277_v16 = vsel %vm1145_vm8, %v1274_v45, %v1276_v49  ;;  %v482_v53 = vld [vmem:[#allocation3 + $0x20] sm:$0xff] }
 0x1fb   : > { %v1281_v52 = vrot.slane %v1250_v46, 2  ;;  %v1383_v45 = vmul.f32 %v2451_v17, %v2442_v57 }
 0x1fc   : > { %1420 = vrot.lane.b32.xlu1 %v1403_v29, %s1862_s21  ;;  %v1272_v21 = vsel %vm1145_vm8, %v1269_v41, %v1271_v58  ;;  %v740_v58 = vmul.f32 %v2476_v50, %v2189_v55 }
 0x1fd   : > { %v1282_v5 = vsel %vm1145_vm8, %v1279_v35, %v1281_v52  ;;  %v1414_v54 = vrot.slane %v1383_v45, 2 }
 0x1fe   : > { %1046 = vrot.lane.b32.xlu0 %v1031_v60, %s1862_s21  ;;  %v767_v46 = vrot.slane %v740_v58, 1 }
 0x1ff   : > { %v1415_v24 = vsel %vm1145_vm8, %v1412_v1, %v1414_v54  ;;  %v485_v54 = vld [vmem:[#allocation3 + $0x38] sm:$0xff] }
 0x200   : > { %1424 = vrot.lane.b32.xlu1 %v2338_v28, %s1862_s21  ;;  %v1377_v28 = vmul.f32 %v2432_v37, %v2370_v61  ;;  %v479_v37 = vld [vmem:[#allocation3 + $0x8] sm:$0xff] }
 0x202   : > { %1285 = vrot.lane.b32.xlu0 %v1267_v23, %s1864_s27  ;;  %v1404_v51 = vrot.slane %v1377_v28, 2 }
 0x204   : > { %1428 = vrot.lane.b32.xlu1 %v1413_v34, %s1862_s21  ;;  %v1405_v31 = vsel %vm1145_vm8, %v1402_v4, %v1404_v51  ;;  %v746_v51 = vmul.f32 %v2495_v27, %v2221_v6 }
 0x206   : > { %1289 = vrot.lane.b32.xlu0 %v1272_v21, %s1864_s27  ;;  %v768_v21 = vrot.slane %v2628_v59, 1 }
 0x208   : > { %v769_v56 = vsel %vm761_vm9, %v767_v46, %v768_v21 }
 0x20a   : > { %1293 = vrot.lane.b32.xlu0 %v1277_v16, %s1864_s27 }
 0x20e   : > { %1297 = vrot.lane.b32.xlu0 %v1282_v5, %s1864_s27 }
 0x212   : > { %1418 = vrot.lane.b32.xlu0 %v2326_v18, %s1862_s21  ;;  %v480_v18 = vld [vmem:[#allocation3 + $0x10] sm:$0xff] }
 0x213   : > { %v544_v41 = vpop.permute.xlu1 %543 }
 0x214   : > { %v567_v19 = vadd.f32 %v544_v41, %v478_v3 }
 0x216   : > { %575 = vst.msk [vmem:[#allocation3] sm:$0xff] %vm469_vm7, %v567_v19  ;;  %1422 = vrot.lane.b32.xlu0 %v1405_v31, %s1862_s21  ;;  %v546_v9 = vpop.permute.xlu0 %545 }
 0x217   : > { %v568_v35 = vadd.f32 %v546_v9, %v479_v37 }
 0x219   : > { %576 = vst.msk [vmem:[#allocation3 + $0x8] sm:$0xff] %vm469_vm7, %v568_v35 }
 0x21a   : > { %1426 = vrot.lane.b32.xlu0 %v2341_v30, %s1862_s21  ;;  %v548_v40 = vpop.permute.xlu1 %547  ;;  %v483_v30 = vld [vmem:[#allocation3 + $0x28] sm:$0xff] }
 0x21b   : > { %v550_v7 = vpop.permute.xlu0 %549  ;;  %v569_v57 = vadd.f32 %v548_v40, %v480_v18 }
 0x21c   : > { %v570_v17 = vadd.f32 %v550_v7, %v481_v25 }
 0x21d   : > { %577 = vst.msk [vmem:[#allocation3 + $0x10] sm:$0xff] %vm469_vm7, %v569_v57  ;;  %v583_v33 = vld [vmem:[#allocation3] sm:$0xff] }
 0x21e   : > { %578 = vst.msk [vmem:[#allocation3 + $0x18] sm:$0xff] %vm469_vm7, %v570_v17  ;;  %1430 = vrot.lane.b32.xlu0 %v1415_v24, %s1862_s21  ;;  %s2701_s21 = scalar_lea.vmem [#allocation7], %s1597_s25  ;;  %s1673_s25 = sshll.u32 %s1847_s12, 10 }
 0x21f   : > { %v552_v4 = vpop.permute.xlu1 %551  ;;  %s1489_s28 = sshll.u32 %s2701_s21, 4  ;;  %s2736_s4 = scalar_lea.hbm %s2790_s2, %s1673_s25  ;;  %s2738_s28 = int_to_ptr.vmem [resolvable:$true] %s1489_s28 }
 0x220   : > { %v571_v39 = vadd.f32 %v552_v4, %v482_v53  ;;  %v584_v17 = vld [vmem:[#allocation3 + $0x8] sm:$0xff]  ;;  %s1775_s6 = scalar_lea.vmem %s2738_s28, 1024  ;;  %s1865_s12 = smov [#allocation7]  }
 0x221   : > { %p1776_p8 = scmp.ne.s32.totalorder %s2738_s28, %s1775_s6  ;;  %s1779_s7 = sshll.u32 %s1865_s12, 4  ;;  %s1780_s7 = int_to_ptr.vmem [resolvable:$false] %s1779_s7 }
 0x222   : > { %579 = vst.msk [vmem:[#allocation3 + $0x20] sm:$0xff] %vm469_vm7, %v571_v39  ;;  %v554_v10 = vpop.permute.xlu0 %553  ;;  %s1781_s8 = scalar_lea.vmem %s1780_s7, 2048  ;;  %p1782_p1 = scmp.lt.s32.totalorder %s2738_s28, %s1780_s7 }
 0x223   : > { %v572_v2 = vadd.f32 %v554_v10, %v483_v30  ;;  %p1777_p12 = pnand %p1776_p8, %p1934_p9  ;;  %p1783_p3 = scmp.lt.s32.totalorder %s1781_s8, %s1775_s6 }
 0x224   : > { %v585_v48 = vld [vmem:[#allocation3 + $0x10] sm:$0xff] }
 0x225   : > { %580 = vst.msk [vmem:[#allocation3 + $0x28] sm:$0xff] %vm469_vm7, %v572_v2  ;;  %v586_v39 = vld [vmem:[#allocation3 + $0x18] sm:$0xff]  ;;  %v742_v2 = vmul.f32 %v2476_v50, %v2370_v61  ;;  %p1778_p0 = pneg %p1777_p12  ;;  %p1784_p5 = por %p1783_p3, %p1782_p1 }
 0x226   : > { %v556_v12 = vpop.permute.xlu1 %555 }
 0x227   : > { %v573_v29 = vadd.f32 %v556_v12, %v484_v22  ;;  %p1785_p6 = pnand %p1784_p5, %p1778_p0 }
 0x229   : > { %581 = vst.msk [vmem:[#allocation3 + $0x30] sm:$0xff] %vm469_vm7, %v573_v29  ;;  %v587_v34 = vld [vmem:[#allocation3 + $0x20] sm:$0xff] }
 0x22a   : > { %v649_v8 = vpop.permute.xlu1 %648 }
 0x22b   : > { %v672_v60 = vadd.f32 %v649_v8, %v583_v33 }
 0x22d   : > { %680 = vst.msk [vmem:[#allocation3] sm:$0xff] %vm469_vm7, %v672_v60  ;;  %v588_v60 = vld [vmem:[#allocation3 + $0x28] sm:$0xff] }
 0x22e   : > { %v653_v1 = vpop.permute.xlu1 %652 }
 0x22f   : > { %v674_v44 = vadd.f32 %v653_v1, %v585_v48 }
 0x230   : > { %v589_v28 = vld [vmem:[#allocation3 + $0x30] sm:$0xff] }
 0x231   : > { %682 = vst.msk [vmem:[#allocation3 + $0x10] sm:$0xff] %vm469_vm7, %v674_v44  ;;  %v770_v44 = vrot.slane %v742_v2, 1 }
 0x232   : > { %v657_v23 = vpop.permute.xlu1 %656 }
 0x233   : > { %v676_v49 = vadd.f32 %v657_v23, %v587_v34 }
 0x234   : > { %v688_v52 = vld [vmem:[#allocation3] sm:$0xff] }
 0x235   : > { %684 = vst.msk [vmem:[#allocation3 + $0x20] sm:$0xff] %vm469_vm7, %v676_v49  ;;  %v790_v16 = vadd.f32 %v2380_v14, %v688_v52  ;;  %v777_v14 = vrot.slane %v746_v51, 1 }
 0x236   : > { %v661_v5 = vpop.permute.xlu1 %660 }
 0x237   : > { %v678_v55 = vadd.f32 %v661_v5, %v589_v28  ;;  %798 = vst.msk [vmem:[#allocation3] sm:$0xff] %vm469_vm7, %v790_v16  ;;  %v779_v6 = vsel %vm761_vm9, %v777_v14, %v778_v26  ;;  %v771_v16 = vsel %vm761_vm9, %v768_v21, %v770_v44 }
 0x238   : > { %v690_v41 = vld [vmem:[#allocation3 + $0x10] sm:$0xff] }
 0x239   : > { %686 = vst.msk [vmem:[#allocation3 + $0x30] sm:$0xff] %vm469_vm7, %v678_v55  ;;  %v792_v3 = vadd.f32 %v769_v56, %v690_v41 }
 0x23a   : > { %v900_v19 = vpop.permute.xlu1 %899 }
 0x23b   : > { %800 = vst.msk [vmem:[#allocation3 + $0x10] sm:$0xff] %vm469_vm7, %v792_v3 }
 0x23c   : > { %v692_v45 = vld [vmem:[#allocation3 + $0x20] sm:$0xff] }
 0x23d   : > { %v794_v31 = vadd.f32 %v2414_v11, %v692_v45 }
 0x23e   : > { %v806_v37 = vld [vmem:[#allocation3] sm:$0xff]  ;;  %v904_v9 = vpop.permute.xlu1 %903 }
 0x23f   : > { %v923_v35 = vadd.f32 %v900_v19, %v806_v37  ;;  %802 = vst.msk [vmem:[#allocation3 + $0x20] sm:$0xff] %vm469_vm7, %v794_v31 }
 0x240   : > { %v558_v18 = vpop.permute.xlu0 %557  ;;  %v694_v40 = vld [vmem:[#allocation3 + $0x30] sm:$0xff] }
 0x241   : > { %v574_v27 = vadd.f32 %v558_v18, %v485_v54  ;;  %931 = vst.msk [vmem:[#allocation3] sm:$0xff] %vm469_vm7, %v923_v35  ;;  %v796_v25 = vadd.f32 %v779_v6, %v694_v40 }
 0x242   : > { %v808_v7 = vld [vmem:[#allocation3 + $0x10] sm:$0xff]  ;;  %v908_v11 = vpop.permute.xlu1 %907 }
 0x243   : > { %582 = vst.msk [vmem:[#allocation3 + $0x38] sm:$0xff] %vm469_vm7, %v574_v27  ;;  %v925_v57 = vadd.f32 %v904_v9, %v808_v7  ;;  %804 = vst.msk [vmem:[#allocation3 + $0x30] sm:$0xff] %vm469_vm7, %v796_v25 }
 0x244   : > { %v651_v24 = vpop.permute.xlu0 %650 }
 0x245   : > { %v673_v4 = vadd.f32 %v651_v24, %v584_v17  ;;  %933 = vst.msk [vmem:[#allocation3 + $0x10] sm:$0xff] %vm469_vm7, %v925_v57 }
 0x246   : > { %v810_v36 = vld [vmem:[#allocation3 + $0x20] sm:$0xff]  ;;  %v912_v26 = vpop.permute.xlu1 %911 }
 0x247   : > { %681 = vst.msk [vmem:[#allocation3 + $0x8] sm:$0xff] %vm469_vm7, %v673_v4  ;;  %v927_v53 = vadd.f32 %v908_v11, %v810_v36 }
 0x248   : > { %v655_v30 = vpop.permute.xlu0 %654  ;;  %v939_v12 = vld [vmem:[#allocation3] sm:$0xff] }
 0x249   : > { %v675_v10 = vadd.f32 %v655_v30, %v586_v39  ;;  %935 = vst.msk [vmem:[#allocation3 + $0x20] sm:$0xff] %vm469_vm7, %v927_v53 }
 0x24a   : > { %v812_v22 = vld [vmem:[#allocation3 + $0x30] sm:$0xff]  ;;  %v1033_v29 = vpop.permute.xlu1 %1032  ;;  %v590_v49 = vld [vmem:[#allocation3 + $0x38] sm:$0xff] }
 0x24b   : > { %683 = vst.msk [vmem:[#allocation3 + $0x18] sm:$0xff] %vm469_vm7, %v675_v10  ;;  %v929_v33 = vadd.f32 %v912_v26, %v812_v22  ;;  %v1056_v8 = vadd.f32 %v1033_v29, %v939_v12 }
 0x24c   : > { %v659_v48 = vpop.permute.xlu0 %658  ;;  %v941_v50 = vld [vmem:[#allocation3 + $0x10] sm:$0xff] }
 0x24d   : > { %v677_v1 = vadd.f32 %v659_v48, %v588_v60  ;;  %937 = vst.msk [vmem:[#allocation3 + $0x30] sm:$0xff] %vm469_vm7, %v929_v33  ;;  %1064 = vst.msk [vmem:[#allocation3] sm:$0xff] %vm469_vm7, %v1056_v8 }
 0x24e   : > { %v689_v58 = vld [vmem:[#allocation3 + $0x8] sm:$0xff]  ;;  %v1037_v61 = vpop.permute.xlu1 %1036 }
 0x24f   : > { %685 = vst.msk [vmem:[#allocation3 + $0x28] sm:$0xff] %vm469_vm7, %v677_v1  ;;  %v791_v23 = vadd.f32 %v2383_v15, %v689_v58  ;;  %v1058_v34 = vadd.f32 %v1037_v61, %v941_v50 }
 0x250   : > { %v663_v46 = vpop.permute.xlu0 %662  ;;  %v943_v5 = vld [vmem:[#allocation3 + $0x20] sm:$0xff] }
 0x251   : > { %v679_v52 = vadd.f32 %v663_v46, %v590_v49  ;;  %799 = vst.msk [vmem:[#allocation3 + $0x8] sm:$0xff] %vm469_vm7, %v791_v23  ;;  %1066 = vst.msk [vmem:[#allocation3 + $0x10] sm:$0xff] %vm469_vm7, %v1058_v34 }
 0x252   : > { %v691_v28 = vld [vmem:[#allocation3 + $0x18] sm:$0xff]  ;;  %v1041_v55 = vpop.permute.xlu1 %1040 }
 0x253   : > { %687 = vst.msk [vmem:[#allocation3 + $0x38] sm:$0xff] %vm469_vm7, %v679_v52  ;;  %v793_v56 = vadd.f32 %v771_v16, %v691_v28  ;;  %v1060_v51 = vadd.f32 %v1041_v55, %v943_v5 }
 0x254   : > { %v902_v15 = vpop.permute.xlu0 %901  ;;  %v1072_v41 = vld [vmem:[#allocation3] sm:$0xff]  ;;  %v945_v21 = vld [vmem:[#allocation3 + $0x30] sm:$0xff] }
 0x255   : > { %801 = vst.msk [vmem:[#allocation3 + $0x18] sm:$0xff] %vm469_vm7, %v793_v56  ;;  %1068 = vst.msk [vmem:[#allocation3 + $0x20] sm:$0xff] %vm469_vm7, %v1060_v51  ;;  %v1174_v3 = vadd.f32 %v2426_v38, %v1072_v41 }
 0x256   : > { %v693_v59 = vld [vmem:[#allocation3 + $0x28] sm:$0xff]  ;;  %v1045_v19 = vpop.permute.xlu1 %1044 }
 0x257   : > { %v795_v14 = vadd.f32 %v2417_v13, %v693_v59  ;;  %v1062_v31 = vadd.f32 %v1045_v19, %v945_v21  ;;  %1182 = vst.msk [vmem:[#allocation3] sm:$0xff] %vm469_vm7, %v1174_v3 }
 0x258   : > { %v807_v45 = vld [vmem:[#allocation3 + $0x8] sm:$0xff]  ;;  %v906_v37 = vpop.permute.xlu0 %905  ;;  %v1074_v35 = vld [vmem:[#allocation3 + $0x10] sm:$0xff] }
 0x259   : > { %v924_v9 = vadd.f32 %v902_v15, %v807_v45  ;;  %803 = vst.msk [vmem:[#allocation3 + $0x28] sm:$0xff] %vm469_vm7, %v795_v14  ;;  %1070 = vst.msk [vmem:[#allocation3 + $0x30] sm:$0xff] %vm469_vm7, %v1062_v31  ;;  %v1176_v54 = vadd.f32 %v2544_v32, %v1074_v35 }
 0x25a   : > { %v695_v18 = vld [vmem:[#allocation3 + $0x38] sm:$0xff]  ;;  %v1284_v38 = vpop.permute.xlu1 %1283 }
 0x25b   : > { %932 = vst.msk [vmem:[#allocation3 + $0x8] sm:$0xff] %vm469_vm7, %v924_v9  ;;  %v797_v6 = vadd.f32 %v2528_v62, %v695_v18  ;;  %1184 = vst.msk [vmem:[#allocation3 + $0x10] sm:$0xff] %vm469_vm7, %v1176_v54 }
 0x25c   : > { %v809_v13 = vld [vmem:[#allocation3 + $0x18] sm:$0xff]  ;;  %v910_v27 = vpop.permute.xlu0 %909  ;;  %v1076_v25 = vld [vmem:[#allocation3 + $0x20] sm:$0xff] }
 0x25d   : > { %v926_v40 = vadd.f32 %v906_v37, %v809_v13  ;;  %805 = vst.msk [vmem:[#allocation3 + $0x38] sm:$0xff] %vm469_vm7, %v797_v6  ;;  %v1178_v7 = vadd.f32 %v2460_v20, %v1076_v25 }
 0x25e   : > { %v1190_v11 = vld [vmem:[#allocation3] sm:$0xff]  ;;  %v1288_v32 = vpop.permute.xlu1 %1287 }
 0x25f   : > { %934 = vst.msk [vmem:[#allocation3 + $0x18] sm:$0xff] %vm469_vm7, %v926_v40  ;;  %v1307_v57 = vadd.f32 %v1284_v38, %v1190_v11  ;;  %1186 = vst.msk [vmem:[#allocation3 + $0x20] sm:$0xff] %vm469_vm7, %v1178_v7 }
 0x260   : > { %v811_v17 = vld [vmem:[#allocation3 + $0x28] sm:$0xff]  ;;  %v914_v24 = vpop.permute.xlu0 %913  ;;  %v1078_v4 = vld [vmem:[#allocation3 + $0x30] sm:$0xff] }
 0x261   : > { %v928_v62 = vadd.f32 %v910_v27, %v811_v17  ;;  %1315 = vst.msk [vmem:[#allocation3] sm:$0xff] %vm469_vm7, %v1307_v57  ;;  %v1180_v36 = vadd.f32 %v2557_v43, %v1078_v4 }
 0x262   : > { %v1192_v26 = vld [vmem:[#allocation3 + $0x10] sm:$0xff]  ;;  %v1292_v53 = vpop.permute.xlu1 %1291  ;;  %v940_v30 = vld [vmem:[#allocation3 + $0x8] sm:$0xff] }
 0x263   : > { %936 = vst.msk [vmem:[#allocation3 + $0x28] sm:$0xff] %vm469_vm7, %v928_v62  ;;  %v1309_v20 = vadd.f32 %v1288_v32, %v1192_v26  ;;  %1188 = vst.msk [vmem:[#allocation3 + $0x30] sm:$0xff] %vm469_vm7, %v1180_v36 }
 0x264   : > { %v813_v39 = vld [vmem:[#allocation3 + $0x38] sm:$0xff]  ;;  %v1035_v10 = vpop.permute.xlu0 %1034 }
 0x265   : > { %v930_v2 = vadd.f32 %v914_v24, %v813_v39  ;;  %v1057_v22 = vadd.f32 %v1035_v10, %v940_v30  ;;  %1317 = vst.msk [vmem:[#allocation3 + $0x10] sm:$0xff] %vm469_vm7, %v1309_v20 }
 0x266   : > { %v1194_v12 = vld [vmem:[#allocation3 + $0x20] sm:$0xff]  ;;  %v1296_v43 = vpop.permute.xlu1 %1295  ;;  %v942_v33 = vld [vmem:[#allocation3 + $0x18] sm:$0xff] }
 0x267   : > { %938 = vst.msk [vmem:[#allocation3 + $0x38] sm:$0xff] %vm469_vm7, %v930_v2  ;;  %1065 = vst.msk [vmem:[#allocation3 + $0x8] sm:$0xff] %vm469_vm7, %v1057_v22  ;;  %v1311_v29 = vadd.f32 %v1292_v53, %v1194_v12 }
 0x268   : > { %v1039_v8 = vpop.permute.xlu0 %1038  ;;  %v1323_v1 = vld [vmem:[#allocation3] sm:$0xff] }
 0x269   : > { %v1059_v60 = vadd.f32 %v1039_v8, %v942_v33  ;;  %1319 = vst.msk [vmem:[#allocation3 + $0x20] sm:$0xff] %vm469_vm7, %v1311_v29 }
 0x26a   : > { %v1196_v48 = vld [vmem:[#allocation3 + $0x30] sm:$0xff]  ;;  %v1417_v44 = vpop.permute.xlu1 %1416  ;;  %v944_v50 = vld [vmem:[#allocation3 + $0x28] sm:$0xff] }
 0x26b   : > { %1067 = vst.msk [vmem:[#allocation3 + $0x18] sm:$0xff] %vm469_vm7, %v1059_v60  ;;  %v1313_v58 = vadd.f32 %v1296_v43, %v1196_v48  ;;  %v1440_v61 = vadd.f32 %v1417_v44, %v1323_v1 }
 0x26c   : > { %v1043_v23 = vpop.permute.xlu0 %1042  ;;  %v1325_v52 = vld [vmem:[#allocation3 + $0x10] sm:$0xff] }
 0x26d   : > { %v1061_v34 = vadd.f32 %v1043_v23, %v944_v50  ;;  %1321 = vst.msk [vmem:[#allocation3 + $0x30] sm:$0xff] %vm469_vm7, %v1313_v58  ;;  %1448 = vst.msk [vmem:[#allocation3] sm:$0xff] %vm469_vm7, %v1440_v61 }
 0x26e   : > { %v1073_v49 = vld [vmem:[#allocation3 + $0x8] sm:$0xff]  ;;  %v1421_v46 = vpop.permute.xlu1 %1420  ;;  %v946_v5 = vld [vmem:[#allocation3 + $0x38] sm:$0xff] }
 0x26f   : > { %1069 = vst.msk [vmem:[#allocation3 + $0x28] sm:$0xff] %vm469_vm7, %v1061_v34  ;;  %v1175_v16 = vadd.f32 %v2429_v63, %v1073_v49  ;;  %v1442_v28 = vadd.f32 %v1421_v46, %v1325_v52 }
 0x270   : > { %v1047_v55 = vpop.permute.xlu0 %1046  ;;  %v1327_v15 = vld [vmem:[#allocation3 + $0x20] sm:$0xff] }
 0x271   : > { %v1063_v56 = vadd.f32 %v1047_v55, %v946_v5  ;;  %1183 = vst.msk [vmem:[#allocation3 + $0x8] sm:$0xff] %vm469_vm7, %v1175_v16  ;;  %1450 = vst.msk [vmem:[#allocation3 + $0x10] sm:$0xff] %vm469_vm7, %v1442_v28 }
 0x272   : > { %v1075_v51 = vld [vmem:[#allocation3 + $0x18] sm:$0xff]  ;;  %v1425_v41 = vpop.permute.xlu1 %1424 }
 0x273   : > { %1071 = vst.msk [vmem:[#allocation3 + $0x38] sm:$0xff] %vm469_vm7, %v1063_v56  ;;  %v1177_v3 = vadd.f32 %v2547_v47, %v1075_v51  ;;  %v1444_v59 = vadd.f32 %v1425_v41, %v1327_v15 }
 0x274   : > { %v1286_v19 = vpop.permute.xlu0 %1285  ;;  %v1456_v21 = vld [vmem:[#allocation3] sm:$0xff]  ;;  %v1329_v45 = vld [vmem:[#allocation3 + $0x30] sm:$0xff] }
 0x275   : > { %1185 = vst.msk [vmem:[#allocation3 + $0x18] sm:$0xff] %vm469_vm7, %v1177_v3  ;;  %1464 = vst.msk [vmem:[%s2701_s21] sm:$0xff] %vm469_vm7, %v1456_v21 }
 0x276   : > { %1452 = vst.msk [vmem:[#allocation3 + $0x20] sm:$0xff] %vm469_vm7, %v1444_v59  ;;  %v1077_v63 = vld [vmem:[#allocation3 + $0x28] sm:$0xff]  ;;  %v1429_v14 = vpop.permute.xlu1 %1428 }
 0x277   : > { %v1179_v31 = vadd.f32 %v2463_v0, %v1077_v63  ;;  %v1446_v37 = vadd.f32 %v1429_v14, %v1329_v45 }
 0x278   : > { %v1191_v47 = vld [vmem:[#allocation3 + $0x8] sm:$0xff]  ;;  %v1290_v9 = vpop.permute.xlu0 %1289  ;;  %v1458_v35 = vld [vmem:[#allocation3 + $0x10] sm:$0xff] }
 0x279   : > { %v1308_v54 = vadd.f32 %v1286_v19, %v1191_v47  ;;  %1187 = vst.msk [vmem:[#allocation3 + $0x28] sm:$0xff] %vm469_vm7, %v1179_v31  ;;  %1466 = vst.msk [vmem:[%s2701_s21 + $0x10] sm:$0xff] %vm469_vm7, %v1458_v35 }
 0x27a   : > { %1454 = vst.msk [vmem:[#allocation3 + $0x30] sm:$0xff] %vm469_vm7, %v1446_v37  ;;  %v1079_v18 = vld [vmem:[#allocation3 + $0x38] sm:$0xff] }
 0x27b   : > { %1316 = vst.msk [vmem:[#allocation3 + $0x8] sm:$0xff] %vm469_vm7, %v1308_v54  ;;  %v1181_v38 = vadd.f32 %v2565_v42, %v1079_v18 }
 0x27c   : > { %v1193_v6 = vld [vmem:[#allocation3 + $0x18] sm:$0xff]  ;;  %v1294_v0 = vpop.permute.xlu0 %1293 }
 0x27d   : > { %v1460_v13 = vld [vmem:[#allocation3 + $0x20] sm:$0xff]  ;;  %v1310_v27 = vadd.f32 %v1290_v9, %v1193_v6  ;;  %1189 = vst.msk [vmem:[#allocation3 + $0x38] sm:$0xff] %vm469_vm7, %v1181_v38 }
 0x27e   : > { %1468 = vst.msk [vmem:[%s2701_s21 + $0x20] sm:$0xff] %vm469_vm7, %v1460_v13 }
 0x27f   : > { %1318 = vst.msk [vmem:[#allocation3 + $0x18] sm:$0xff] %vm469_vm7, %v1310_v27 }
 0x280   : > { %v1195_v40 = vld [vmem:[#allocation3 + $0x28] sm:$0xff]  ;;  %v1298_v25 = vpop.permute.xlu0 %1297 }
 0x281   : > { %v1462_v7 = vld [vmem:[#allocation3 + $0x30] sm:$0xff]  ;;  %v1312_v11 = vadd.f32 %v1294_v0, %v1195_v40 }
 0x282   : > { %1470 = vst.msk [vmem:[%s2701_s21 + $0x30] sm:$0xff] %vm469_vm7, %v1462_v7  ;;  %v1324_v32 = vld [vmem:[#allocation3 + $0x8] sm:$0xff] }
 0x283   : > { %1320 = vst.msk [vmem:[#allocation3 + $0x28] sm:$0xff] %vm469_vm7, %v1312_v11 }
 0x284   : > { %v1197_v42 = vld [vmem:[#allocation3 + $0x38] sm:$0xff]  ;;  %v1419_v57 = vpop.permute.xlu0 %1418 }
 0x285   : > { %v1314_v17 = vadd.f32 %v1298_v25, %v1197_v42  ;;  %v1441_v24 = vadd.f32 %v1419_v57, %v1324_v32 }
 0x286   : > { %v1326_v62 = vld [vmem:[#allocation3 + $0x18] sm:$0xff] }
 0x287   : > { %1322 = vst.msk [vmem:[#allocation3 + $0x38] sm:$0xff] %vm469_vm7, %v1314_v17  ;;  %1449 = vst.msk [vmem:[#allocation3 + $0x8] sm:$0xff] %vm469_vm7, %v1441_v24 }
 0x288   : > { %v1423_v4 = vpop.permute.xlu0 %1422 }
 0x289   : > { %v1443_v36 = vadd.f32 %v1423_v4, %v1326_v62 }
 0x28a   : > { %v1328_v26 = vld [vmem:[#allocation3 + $0x28] sm:$0xff] }
 0x28b   : > { %1451 = vst.msk [vmem:[#allocation3 + $0x18] sm:$0xff] %vm469_vm7, %v1443_v36 }
 0x28c   : > { %v1427_v53 = vpop.permute.xlu0 %1426 }
 0x28d   : > { %v1445_v20 = vadd.f32 %v1427_v53, %v1328_v26 }
 0x28e   : > { %v1457_v39 = vld [vmem:[#allocation3 + $0x8] sm:$0xff]  ;;  %v1330_v30 = vld [vmem:[#allocation3 + $0x38] sm:$0xff] }
 0x28f   : > { %1465 = vst.msk [vmem:[%s2701_s21 + $0x8] sm:$0xff] %vm469_vm7, %v1457_v39  ;;  %1453 = vst.msk [vmem:[#allocation3 + $0x28] sm:$0xff] %vm469_vm7, %v1445_v20 }
 0x290   : > { %v1431_v10 = vpop.permute.xlu0 %1430 }
 0x291   : > { %v1447_v2 = vadd.f32 %v1431_v10, %v1330_v30 }
 0x292   : > { %v1459_v22 = vld [vmem:[#allocation3 + $0x18] sm:$0xff] }
 0x293   : > { %1467 = vst.msk [vmem:[%s2701_s21 + $0x18] sm:$0xff] %vm469_vm7, %v1459_v22  ;;  %1455 = vst.msk [vmem:[#allocation3 + $0x38] sm:$0xff] %vm469_vm7, %v1447_v2 }
 0x296   : > { %v1461_v12 = vld [vmem:[#allocation3 + $0x28] sm:$0xff] }
 0x297   : > { %1469 = vst.msk [vmem:[%s2701_s21 + $0x28] sm:$0xff] %vm469_vm7, %v1461_v12 }
 0x29a   : > { %v1463_v43 = vld [vmem:[#allocation3 + $0x38] sm:$0xff] }
 0x29b   : > { %1471 = vst.msk [vmem:[%s2701_s21 + $0x38] sm:$0xff] %vm469_vm7, %v1463_v43 }
 0x29c   : > { %1788 = shalt.err (!%p1785_p6)
}
 0x29d   : > { %s1789_s15 = scalar_lea.hbm %s2736_s4, 1024  ;;  %s1793_s3 = scalar_lea.hbm %s2790_s2, 2048 }
 0x29e   : > { %p1790_p7 = scmp.ne.s32.totalorder %s2736_s4, %s1789_s15  ;;  %p1794_p13 = scmp.lt.s32.totalorder %s2736_s4, %s2790_s2 }
 0x29f   : > { %p1795_p2 = scmp.lt.s32.totalorder %s1793_s3, %s1789_s15 }
 0x2a0   : > { %p1791_p10 = pnand %p1790_p7, %p1934_p9 }
 0x2a1   : > { %p1796_p8 = por %p1795_p2, %p1794_p13 }
 0x2a2   : > { %p1792_p4 = pneg %p1791_p10 }
 0x2a4   : > { %p1797_p12 = pnand %p1796_p8, %p1792_p4 }
 0x2a6   : > { %1800 = shalt.err (!%p1797_p12)
}
 0x2a7   : > { %s1866_s27 = smov 128   ;;  %s1867_s21 = smov 8  }
 0x2a8   : > { %1676 = dma.vmem_to_hbm [thread:$0]  (%p1934_p9), %s2738_s28, 1024, %s2736_s4, %s1473_s5, %s1866_s27, %s1866_s27, %s1867_s21  }
 0x2a9 PF: > { %s1504_s25 = sand.u32 1, %s1835_s9   ;;  %p2798_p0 = scmp.ge.s32.totalorder %s1855_s14, 2 }
 0x2aa   : > { %s1505_s29 = scalar_lea.sflag [#allocation6], %s1504_s25 }
 0x2ab   : > { %p1683_p1 = pnand %p2798_p0, %p1941_p11 }
 0x2ad   : > { %p1684_p3 = pneg %p1683_p1 }
 0x2af   : > { %1830 = dma.done.wait (%p1684_p3), %s1505_s29, 1024  }
 0x2b0   : > { %1832 = vsyncadd (%p1684_p3), %s1505_s29, 4294966272  ;;  %s18_s14 = sadd.s32 1, %s1855_s14   ;;  %s2799_s9 = smov %s1839_s10 }
 0x2b1   : > { %p15_p5 = scmp.ge.s32.totalorder %s18_s14, 4   ;;  %s2800_s10 = smov %s1843_s11 }
 0x2b2   : > { %s2801_s11 = smov %s1939_s23  ;;  %s2802_s12 = smov %s1851_s13 }
 0x2b3   : > { %s2803_s13 = smov %s2805_s17  ;;  %17 = sbr.rel (!%p15_p5) target bundleno = 6 (0x6), region = 84 }
 0x2b8   :  { %1510 = vsyncpa [#allocation5], 1 }
 0x2b9   :  { %1512 = vsyncpa [#allocation5 + $0x1], 1 }
 0x2ba   :  { %1513 = vsyncpa [#allocation6], 1 }
 0x2bb   :  { %1515 = vsyncpa [#allocation6 + $0x1], 1 }

</bundles_post_ra>
